<compile_context>
chip_gen: v7x
topology: tpu7x:2x2x1
jax: 0.10.0
libtpu: 0.0.40
codegen_flags: <defaults>
</compile_context>

<pallas_src>
import functools

import jax
import jax.numpy as jnp
from jax import lax
from jax.experimental import pallas as pl
from jax.experimental.pallas import tpu as pltpu

PAIR_CHANNEL = 128
SEQ_CHANNEL = 384
REL_CHANNEL = 139                  # 267 - 128
TGT_CHANNEL = 447                  # 831 - 384
C_PAIR_COND_INITIAL = 267
C_SINGLE_COND_INITIAL = 831
TRANSITION_FACTOR = 2              # swiglu expansion factor
LN_EPS = 1e-5


def _round_up(x, m):
    return (x + m - 1) // m * m


def _const_spec(shape):
    # Whole (small) array resident in VMEM for every grid step.
    return pl.BlockSpec(shape, lambda i: tuple(0 for _ in shape))


# ----------------------------------------------------------------------------
# Kernels
# ----------------------------------------------------------------------------
def _transition(h, w_in, w_out):
    """AF3 DiffusionTransition (c_single_cond=None): LN -> swiglu -> project.

    LN gamma is pre-folded into w_in.  Element-wise math in f32 (VPU); matmul operands
    cast to bf16, f32 accumulation.
    """
    mu = jnp.mean(h, axis=-1, keepdims=True)
    d = h - mu
    var = jnp.mean(d * d, axis=-1, keepdims=True)
    hn = (d * lax.rsqrt(var + LN_EPS)).astype(jnp.bfloat16)
    b = jnp.dot(hn, w_in, preferred_element_type=jnp.float32)        # [T, 512]
    half = b.shape[-1] // 2                                          # 256-lane boundary
    gated = (jax.nn.silu(b[:, :half]) * b[:, half:]).astype(jnp.bfloat16)
    return jnp.dot(gated, w_out, preferred_element_type=jnp.float32)  # [T, 128]


def pair_cond_kernel(p_ref, r_ref, w0p_ref, w0r_ref,
                     w1a_ref, w1b_ref, w2a_ref, w2b_ref, out_ref):
    """pair_cond = Proj(LN(concat(pair, rel))) ; += Transition0 ; += Transition1.

    Concat is fused: LN stats span both pieces, projection is split.  LN gammas are
    pre-folded into w0p/w0r/w1a/w2a.  All math is per-row, so ragged (masked) row blocks
    are safe.
    """
    p = p_ref[...].astype(jnp.float32)                                # [T, 128]
    r = r_ref[...].astype(jnp.float32)                                # [T, 139]
    inv_c = jnp.float32(1.0 / C_PAIR_COND_INITIAL)
    mu = (jnp.sum(p, -1, keepdims=True) + jnp.sum(r, -1, keepdims=True)) * inv_c
    dp = p - mu
    dr = r - mu
    var = (jnp.sum(dp * dp, -1, keepdims=True)
           + jnp.sum(dr * dr, -1, keepdims=True)) * inv_c             # two-pass, >= 0
    inv_std = lax.rsqrt(var + LN_EPS)
    pn = (dp * inv_std).astype(jnp.bfloat16)
    rn = (dr * inv_std).astype(jnp.bfloat16)
    pc = (jnp.dot(pn, w0p_ref[...], preferred_element_type=jnp.float32)
          + jnp.dot(rn, w0r_ref[...], preferred_element_type=jnp.float32))  # [T, 128]
    pc = pc + _transition(pc, w1a_ref[...], w1b_ref[...])
    pc = pc + _transition(pc, w2a_ref[...], w2b_ref[...])
    out_ref[...] = pc.astype(out_ref.dtype)


def single_cond_kernel(s_ref, t_ref, ws_ref, wt_ref, out_ref):
    """single_cond = Proj(LN(concat(single, target_feat))) — concat fused, gamma folded."""
    s = s_ref[...].astype(jnp.float32)                                # [T, 384]
    t = t_ref[...].astype(jnp.float32)                                # [T, 447]
    inv_c = jnp.float32(1.0 / C_SINGLE_COND_INITIAL)
    mu = (jnp.sum(s, -1, keepdims=True) + jnp.sum(t, -1, keepdims=True)) * inv_c
    ds = s - mu
    dt = t - mu
    var = (jnp.sum(ds * ds, -1, keepdims=True)
           + jnp.sum(dt * dt, -1, keepdims=True)) * inv_c
    inv_std = lax.rsqrt(var + LN_EPS)
    sn = (ds * inv_std).astype(jnp.bfloat16)
    tn = (dt * inv_std).astype(jnp.bfloat16)
    out = (jnp.dot(sn, ws_ref[...], preferred_element_type=jnp.float32)
           + jnp.dot(tn, wt_ref[...], preferred_element_type=jnp.float32))
    out_ref[...] = out.astype(out_ref.dtype)


# ----------------------------------------------------------------------------
# One-time parameter preparation (outside the per-call path)
# ----------------------------------------------------------------------------
def prepare_pair_params(pair_params):
    """Fold LN gammas into the following weights (f32), then a single bf16 cast."""
    g0, w0, g1, w1a, w1b, g2, w2a, w2b = pair_params
    w0f = g0.reshape(-1)[:, None] * w0                     # diag(g0) @ w0, f32
    w0p = w0f[:PAIR_CHANNEL].astype(jnp.bfloat16)
    w0r = w0f[PAIR_CHANNEL:].astype(jnp.bfloat16)
    w1a_f = (g1.reshape(-1)[:, None] * w1a).astype(jnp.bfloat16)
    w2a_f = (g2.reshape(-1)[:, None] * w2a).astype(jnp.bfloat16)
    return (w0p, w0r, w1a_f, w1b.astype(jnp.bfloat16), w2a_f, w2b.astype(jnp.bfloat16))


def prepare_single_params(single_params):
    g, w = single_params
    wf = g.reshape(-1)[:, None] * w
    return (wf[:SEQ_CHANNEL].astype(jnp.bfloat16), wf[SEQ_CHANNEL:].astype(jnp.bfloat16))


def prepare_params(params):
    return {"pair": prepare_pair_params(params["pair"]),
            "single": prepare_single_params(params["single"])}


# ----------------------------------------------------------------------------
# Wrappers
# ----------------------------------------------------------------------------
@functools.partial(jax.jit, static_argnames=("tile_rows", "out_dtype"))
def pair_conditioning(pair_flat, rel_flat, kparams, *, tile_rows=2048,
                      out_dtype=jnp.float32):
    """pair_flat: [R, 128], rel_flat: [R, 139] -> pair_cond [R, 128]."""
    R = pair_flat.shape[0]
    assert pair_flat.shape[1] == PAIR_CHANNEL and rel_flat.shape[1] == REL_CHANNEL
    w0p, w0r, w1a, w1b, w2a, w2b = kparams

    # Large row tiles for MXU occupancy / DMA burst efficiency; shrink for tiny inputs.
    tile = min(tile_rows, _round_up(R, 8))
    # Ragged final block: no wrapper-side padding (would re-stream the whole slab through
    # HBM).  OOB input rows are garbage but all math is per-row; OOB output stores masked.
    grid = pl.cdiv(R, tile)

    hid = 2 * TRANSITION_FACTOR * PAIR_CHANNEL    # 512 (swiglu pre-activation)
    inter = TRANSITION_FACTOR * PAIR_CHANNEL      # 256

    return pl.pallas_call(
        pair_cond_kernel,
        out_shape=jax.ShapeDtypeStruct((R, PAIR_CHANNEL), out_dtype),
        grid=(grid,),
        in_specs=[
            pl.BlockSpec((tile, PAIR_CHANNEL), lambda i: (i, 0)),
            pl.BlockSpec((tile, REL_CHANNEL), lambda i: (i, 0)),
            _const_spec((PAIR_CHANNEL, PAIR_CHANNEL)),
            _const_spec((REL_CHANNEL, PAIR_CHANNEL)),
            _const_spec((PAIR_CHANNEL, hid)),
            _const_spec((inter, PAIR_CHANNEL)),
            _const_spec((PAIR_CHANNEL, hid)),
            _const_spec((inter, PAIR_CHANNEL)),
        ],
        out_specs=pl.BlockSpec((tile, PAIR_CHANNEL), lambda i: (i, 0)),
        compiler_params=pltpu.CompilerParams(
            dimension_semantics=("parallel",),       # shards rows across 2 TCs on v7x
            vmem_limit_bytes=48 * 1024 * 1024),      # ~20-26 MiB/step at tile=2048
    )(pair_flat, rel_flat, w0p, w0r, w1a, w1b, w2a, w2b)


@functools.partial(jax.jit, static_argnames=("tile_rows", "out_dtype"))
def single_conditioning(single, target_feat, kparams, *, tile_rows=256,
                        out_dtype=jnp.float32):
    """single: [N, 384], target_feat: [N, 447] -> single_cond [N, 384]."""
    N = single.shape[0]
    assert single.shape[1] == SEQ_CHANNEL and target_feat.shape[1] == TGT_CHANNEL
    ws, wt = kparams
    tile = min(tile_rows, _round_up(N, 8))
    grid = pl.cdiv(N, tile)
    return pl.pallas_call(
        single_cond_kernel,
        out_shape=jax.ShapeDtypeStruct((N, SEQ_CHANNEL), out_dtype),
        grid=(grid,),
        in_specs=[
            pl.BlockSpec((tile, SEQ_CHANNEL), lambda i: (i, 0)),
            pl.BlockSpec((tile, TGT_CHANNEL), lambda i: (i, 0)),
            _const_spec((SEQ_CHANNEL, SEQ_CHANNEL)),
            _const_spec((TGT_CHANNEL, SEQ_CHANNEL)),
        ],
        out_specs=pl.BlockSpec((tile, SEQ_CHANNEL), lambda i: (i, 0)),
        compiler_params=pltpu.CompilerParams(
            dimension_semantics=("parallel",),
            vmem_limit_bytes=32 * 1024 * 1024),
    )(single, target_feat, ws, wt)


def diffusion_head_conditioning(rel_features, single, pair, target_feat, kernel_params):
    """JAX glue for DiffusionHead._conditioning; hot math runs in Pallas kernels.

    No wrapper-side concatenate or pad: [N,N,C]->[N*N,C] reshapes are free row-major views.
    `kernel_params` must come from prepare_params(...) (gamma-folded, bf16 weights).
    """
    N = pair.shape[0]
    pair_flat = pair.reshape(N * N, PAIR_CHANNEL)
    rel_flat = rel_features.reshape(N * N, REL_CHANNEL)
    pair_cond = pair_conditioning(pair_flat, rel_flat, kernel_params["pair"]).reshape(
        N, N, PAIR_CHANNEL)
    single_cond = single_conditioning(single, target_feat, kernel_params["single"])
    return pair_cond, single_cond


# ----------------------------------------------------------------------------
# Deterministic synthetic parameters
# ----------------------------------------------------------------------------
def init_params(key):
    # Linear weights stored as [in, out] (transpose of PyTorch's [out, in]) so the
    # kernel does x @ W directly; purely a storage convention.
    ks = jax.random.split(key, 11)
    cp = PAIR_CHANNEL
    hid = 2 * TRANSITION_FACTOR * cp
    inter = TRANSITION_FACTOR * cp
    s = 0.02

    def gamma(k, n):   # non-trivial LN gamma so the weight-fold path is actually tested
        return 1.0 + 0.1 * jax.random.normal(k, (1, n), jnp.float32)

    pair_params = (
        gamma(ks[8], C_PAIR_COND_INITIAL),                                      # LN gamma
        s * jax.random.normal(ks[0], (C_PAIR_COND_INITIAL, cp), jnp.float32),   # proj
        gamma(ks[9], cp),                                                       # T0 LN gamma
        s * jax.random.normal(ks[1], (cp, hid), jnp.float32),                   # T0 in
        s * jax.random.normal(ks[2], (inter, cp), jnp.float32),                 # T0 out
        gamma(ks[10], cp),                                                      # T1 LN gamma
        s * jax.random.normal(ks[3], (cp, hid), jnp.float32),                   # T1 in
        s * jax.random.normal(ks[4], (inter, cp), jnp.float32),                 # T1 out
    )
    single_params = (
        gamma(ks[6], C_SINGLE_COND_INITIAL),                                               # LN gamma
        s * jax.random.normal(ks[5], (C_SINGLE_COND_INITIAL, SEQ_CHANNEL), jnp.float32),   # proj
    )
    return {"pair": pair_params, "single": single_params}


# ----------------------------------------------------------------------------
# Pure-f32 reference (the PyTorch spec) for correctness check
# ----------------------------------------------------------------------------
def _ref_ln(x, g):
    mu = x.mean(-1, keepdims=True)
    var = ((x - mu) ** 2).mean(-1, keepdims=True)
    return (x - mu) / jnp.sqrt(var + LN_EPS) * g


def _ref_dot(a, b):
    return jnp.dot(a, b, precision=lax.Precision.HIGHEST)


def reference_conditioning(rel_features, single, pair, target_feat, params):
    g0, w0, g1, w1a, w1b, g2, w2a, w2b = params["pair"]
    f2d = jnp.concatenate([pair, rel_features], -1)
    pc = _ref_dot(_ref_ln(f2d, g0[0]), w0)

    def trans(h, g, wa, wb):
        b = _ref_dot(_ref_ln(h, g[0]), wa)
        half = b.shape[-1] // 2
        return _ref_dot(jax.nn.silu(b[..., :half]) * b[..., half:], wb)

    pc = pc + trans(pc, g1, w1a, w1b)
    pc = pc + trans(pc, g2, w2a, w2b)

    gs, ws = params["single"]
    f1d = jnp.concatenate([single, target_feat], -1)
    sc = _ref_dot(_ref_ln(f1d, gs[0]), ws)
    return pc, sc


# ----------------------------------------------------------------------------
if __name__ == "__main__":
    key = jax.random.PRNGKey(0)
    k_param, k1, k2, k3, k4 = jax.random.split(key, 5)
    params = init_params(k_param)
    kparams = prepare_params(params)          # one-time gamma-fold + bf16 cast

    N = 8  # number of tokens (small test size)
    pair = jax.random.normal(k1, (N, N, PAIR_CHANNEL), jnp.float32)
    rel_features = jax.random.normal(k2, (N, N, REL_CHANNEL), jnp.float32)     # 139
    single = jax.random.normal(k3, (N, SEQ_CHANNEL), jnp.float32)              # 384
    target_feat = jax.random.normal(k4, (N, TGT_CHANNEL), jnp.float32)         # 447

    pair_cond, single_cond = diffusion_head_conditioning(
        rel_features, single, pair, target_feat, kparams)
    jax.block_until_ready((pair_cond, single_cond))

    pc_ref, sc_ref = reference_conditioning(
        rel_features, single, pair, target_feat, params)
    assert pair_cond.shape == (N, N, PAIR_CHANNEL)
    assert single_cond.shape == (N, SEQ_CHANNEL)
    # Kernel uses bf16 MXU operands (gamma folded into weights) with f32 accumulation;
    # expected max deviation from the full-f32 reference is ~1e-3 on O(0.3)-scale outputs,
    # so 2e-2 tolerance is comfortable.
    assert jnp.allclose(pair_cond, pc_ref, atol=2e-2, rtol=2e-2), \
        float(jnp.max(jnp.abs(pair_cond - pc_ref)))
    assert jnp.allclose(single_cond, sc_ref, atol=2e-2, rtol=2e-2), \
        float(jnp.max(jnp.abs(single_cond - sc_ref)))

    print("KERNEL_OK")
</pallas_src>

<mosaic_0001>
module attributes {stable_mosaic.version = 11 : i64} {
  func.func @pair_cond_kernel(%arg0: i32, %arg1: memref<64x128xf32, #tpu.memory_space<vmem>>, %arg2: memref<64x139xf32, #tpu.memory_space<vmem>>, %arg3: memref<128x128xbf16, #tpu.memory_space<vmem>>, %arg4: memref<139x128xbf16, #tpu.memory_space<vmem>>, %arg5: memref<128x512xbf16, #tpu.memory_space<vmem>>, %arg6: memref<256x128xbf16, #tpu.memory_space<vmem>>, %arg7: memref<128x512xbf16, #tpu.memory_space<vmem>>, %arg8: memref<256x128xbf16, #tpu.memory_space<vmem>>, %arg9: memref<64x128xf32, #tpu.memory_space<vmem>>) attributes {dimension_semantics = [#tpu.dimension_semantics<parallel>], iteration_bounds = array<i64: 1>, scalar_prefetch = 0 : i64, scratch_operands = 0 : i64, tpu.core_type = #tpu.core_type<tc>, window_params = [{transform_indices = @transform_0, window_bounds = array<i64: 64, 128>}, {transform_indices = @transform_1, window_bounds = array<i64: 64, 139>}, {pipeline_mode = #tpu.pipeline_mode<synchronous>, transform_indices = @transform_2, window_bounds = array<i64: 128, 128>}, {pipeline_mode = #tpu.pipeline_mode<synchronous>, transform_indices = @transform_3, window_bounds = array<i64: 139, 128>}, {pipeline_mode = #tpu.pipeline_mode<synchronous>, transform_indices = @transform_4, window_bounds = array<i64: 128, 512>}, {pipeline_mode = #tpu.pipeline_mode<synchronous>, transform_indices = @transform_5, window_bounds = array<i64: 256, 128>}, {pipeline_mode = #tpu.pipeline_mode<synchronous>, transform_indices = @transform_6, window_bounds = array<i64: 128, 512>}, {pipeline_mode = #tpu.pipeline_mode<synchronous>, transform_indices = @transform_7, window_bounds = array<i64: 256, 128>}, {transform_indices = @transform_8, window_bounds = array<i64: 64, 128>}]} {
    %c0 = arith.constant 0 : index
    %c0_0 = arith.constant 0 : index
    %0 = vector.load %arg1[%c0, %c0_0] : memref<64x128xf32, #tpu.memory_space<vmem>>, vector<64x128xf32>
    %c0_1 = arith.constant 0 : index
    %c0_2 = arith.constant 0 : index
    %1 = vector.load %arg2[%c0_1, %c0_2] : memref<64x139xf32, #tpu.memory_space<vmem>>, vector<64x139xf32>
    %cst = arith.constant dense<0.000000e+00> : vector<64xf32>
    %2 = vector.multi_reduction <add>, %0, %cst [1] : vector<64x128xf32> to vector<64xf32>
    %3 = vector.shape_cast %2 : vector<64xf32> to vector<64x1xf32>
    %cst_3 = arith.constant dense<0.000000e+00> : vector<64xf32>
    %4 = vector.multi_reduction <add>, %1, %cst_3 [1] : vector<64x139xf32> to vector<64xf32>
    %5 = vector.shape_cast %4 : vector<64xf32> to vector<64x1xf32>
    %6 = arith.addf %3, %5 : vector<64x1xf32>
    %cst_4 = arith.constant 0.00374531839 : f32
    %7 = vector.broadcast %cst_4 : f32 to vector<64x1xf32>
    %8 = arith.mulf %6, %7 : vector<64x1xf32>
    %9 = vector.broadcast %8 : vector<64x1xf32> to vector<64x128xf32>
    %10 = arith.subf %0, %9 : vector<64x128xf32>
    %11 = vector.broadcast %8 : vector<64x1xf32> to vector<64x139xf32>
    %12 = arith.subf %1, %11 : vector<64x139xf32>
    %13 = arith.mulf %10, %10 : vector<64x128xf32>
    %cst_5 = arith.constant dense<0.000000e+00> : vector<64xf32>
    %14 = vector.multi_reduction <add>, %13, %cst_5 [1] : vector<64x128xf32> to vector<64xf32>
    %15 = vector.shape_cast %14 : vector<64xf32> to vector<64x1xf32>
    %16 = arith.mulf %12, %12 : vector<64x139xf32>
    %cst_6 = arith.constant dense<0.000000e+00> : vector<64xf32>
    %17 = vector.multi_reduction <add>, %16, %cst_6 [1] : vector<64x139xf32> to vector<64xf32>
    %18 = vector.shape_cast %17 : vector<64xf32> to vector<64x1xf32>
    %19 = arith.addf %15, %18 : vector<64x1xf32>
    %cst_7 = arith.constant 0.00374531839 : f32
    %20 = vector.broadcast %cst_7 : f32 to vector<64x1xf32>
    %21 = arith.mulf %19, %20 : vector<64x1xf32>
    %cst_8 = arith.constant 9.99999974E-6 : f32
    %22 = vector.broadcast %cst_8 : f32 to vector<64x1xf32>
    %23 = arith.addf %21, %22 : vector<64x1xf32>
    %24 = math.rsqrt %23 : vector<64x1xf32>
    %25 = vector.broadcast %24 : vector<64x1xf32> to vector<64x128xf32>
    %26 = arith.mulf %10, %25 : vector<64x128xf32>
    %27 = arith.truncf %26 : vector<64x128xf32> to vector<64x128xbf16>
    %28 = vector.broadcast %24 : vector<64x1xf32> to vector<64x139xf32>
    %29 = arith.mulf %12, %28 : vector<64x139xf32>
    %30 = arith.truncf %29 : vector<64x139xf32> to vector<64x139xbf16>
    %c0_9 = arith.constant 0 : index
    %c0_10 = arith.constant 0 : index
    %31 = vector.load %arg3[%c0_9, %c0_10] : memref<128x128xbf16, #tpu.memory_space<vmem>>, vector<128x128xbf16>
    %cst_11 = arith.constant dense<0.000000e+00> : vector<64x128xf32>
    %32 = tpu.matmul %27, %31, %cst_11 {dimension_numbers = #tpu.dot_dimension_numbers<[1], [0], [0], [1], [0, 0, 1, 1], [], []>} : vector<64x128xbf16>, vector<128x128xbf16>, vector<64x128xf32> -> vector<64x128xf32>
    %c0_12 = arith.constant 0 : index
    %c0_13 = arith.constant 0 : index
    %33 = vector.load %arg4[%c0_12, %c0_13] : memref<139x128xbf16, #tpu.memory_space<vmem>>, vector<139x128xbf16>
    %cst_14 = arith.constant dense<0.000000e+00> : vector<64x128xf32>
    %34 = tpu.matmul %30, %33, %cst_14 {dimension_numbers = #tpu.dot_dimension_numbers<[1], [0], [0], [1], [0, 0, 1, 1], [], []>} : vector<64x139xbf16>, vector<139x128xbf16>, vector<64x128xf32> -> vector<64x128xf32>
    %35 = arith.addf %32, %34 : vector<64x128xf32>
    %c0_15 = arith.constant 0 : index
    %c0_16 = arith.constant 0 : index
    %36 = vector.load %arg5[%c0_15, %c0_16] : memref<128x512xbf16, #tpu.memory_space<vmem>>, vector<128x512xbf16>
    %c0_17 = arith.constant 0 : index
    %c0_18 = arith.constant 0 : index
    %37 = vector.load %arg6[%c0_17, %c0_18] : memref<256x128xbf16, #tpu.memory_space<vmem>>, vector<256x128xbf16>
    %cst_19 = arith.constant dense<0.000000e+00> : vector<64xf32>
    %38 = vector.multi_reduction <add>, %35, %cst_19 [1] : vector<64x128xf32> to vector<64xf32>
    %39 = vector.shape_cast %38 : vector<64xf32> to vector<64x1xf32>
    %cst_20 = arith.constant 1.280000e+02 : f32
    %40 = vector.broadcast %cst_20 : f32 to vector<64x1xf32>
    %41 = arith.divf %39, %40 : vector<64x1xf32>
    %42 = vector.broadcast %41 : vector<64x1xf32> to vector<64x128xf32>
    %43 = arith.subf %35, %42 : vector<64x128xf32>
    %44 = arith.mulf %43, %43 : vector<64x128xf32>
    %cst_21 = arith.constant dense<0.000000e+00> : vector<64xf32>
    %45 = vector.multi_reduction <add>, %44, %cst_21 [1] : vector<64x128xf32> to vector<64xf32>
    %46 = vector.shape_cast %45 : vector<64xf32> to vector<64x1xf32>
    %cst_22 = arith.constant 1.280000e+02 : f32
    %47 = vector.broadcast %cst_22 : f32 to vector<64x1xf32>
    %48 = arith.divf %46, %47 : vector<64x1xf32>
    %cst_23 = arith.constant 9.99999974E-6 : f32
    %49 = vector.broadcast %cst_23 : f32 to vector<64x1xf32>
    %50 = arith.addf %48, %49 : vector<64x1xf32>
    %51 = math.rsqrt %50 : vector<64x1xf32>
    %52 = vector.broadcast %51 : vector<64x1xf32> to vector<64x128xf32>
    %53 = arith.mulf %43, %52 : vector<64x128xf32>
    %54 = arith.truncf %53 : vector<64x128xf32> to vector<64x128xbf16>
    %cst_24 = arith.constant dense<0.000000e+00> : vector<64x512xf32>
    %55 = tpu.matmul %54, %36, %cst_24 {dimension_numbers = #tpu.dot_dimension_numbers<[1], [0], [0], [1], [0, 0, 1, 1], [], []>} : vector<64x128xbf16>, vector<128x512xbf16>, vector<64x512xf32> -> vector<64x512xf32>
    %56 = vector.extract_strided_slice %55 {offsets = [0, 0], sizes = [64, 256], strides = [1, 1]} : vector<64x512xf32> to vector<64x256xf32>
    %57 = arith.negf %56 : vector<64x256xf32>
    %58 = math.exp %57 : vector<64x256xf32>
    %cst_25 = arith.constant 1.000000e+00 : f32
    %59 = vector.broadcast %cst_25 : f32 to vector<64x256xf32>
    %60 = arith.addf %59, %58 : vector<64x256xf32>
    %61 = arith.divf %59, %60 : vector<64x256xf32>
    %62 = arith.mulf %56, %61 : vector<64x256xf32>
    %63 = vector.extract_strided_slice %55 {offsets = [0, 256], sizes = [64, 256], strides = [1, 1]} : vector<64x512xf32> to vector<64x256xf32>
    %64 = arith.mulf %62, %63 : vector<64x256xf32>
    %65 = arith.truncf %64 : vector<64x256xf32> to vector<64x256xbf16>
    %cst_26 = arith.constant dense<0.000000e+00> : vector<64x128xf32>
    %66 = tpu.matmul %65, %37, %cst_26 {dimension_numbers = #tpu.dot_dimension_numbers<[1], [0], [0], [1], [0, 0, 1, 1], [], []>} : vector<64x256xbf16>, vector<256x128xbf16>, vector<64x128xf32> -> vector<64x128xf32>
    %67 = arith.addf %35, %66 : vector<64x128xf32>
    %c0_27 = arith.constant 0 : index
    %c0_28 = arith.constant 0 : index
    %68 = vector.load %arg7[%c0_27, %c0_28] : memref<128x512xbf16, #tpu.memory_space<vmem>>, vector<128x512xbf16>
    %c0_29 = arith.constant 0 : index
    %c0_30 = arith.constant 0 : index
    %69 = vector.load %arg8[%c0_29, %c0_30] : memref<256x128xbf16, #tpu.memory_space<vmem>>, vector<256x128xbf16>
    %cst_31 = arith.constant dense<0.000000e+00> : vector<64xf32>
    %70 = vector.multi_reduction <add>, %67, %cst_31 [1] : vector<64x128xf32> to vector<64xf32>
    %71 = vector.shape_cast %70 : vector<64xf32> to vector<64x1xf32>
    %cst_32 = arith.constant 1.280000e+02 : f32
    %72 = vector.broadcast %cst_32 : f32 to vector<64x1xf32>
    %73 = arith.divf %71, %72 : vector<64x1xf32>
    %74 = vector.broadcast %73 : vector<64x1xf32> to vector<64x128xf32>
    %75 = arith.subf %67, %74 : vector<64x128xf32>
    %76 = arith.mulf %75, %75 : vector<64x128xf32>
    %cst_33 = arith.constant dense<0.000000e+00> : vector<64xf32>
    %77 = vector.multi_reduction <add>, %76, %cst_33 [1] : vector<64x128xf32> to vector<64xf32>
    %78 = vector.shape_cast %77 : vector<64xf32> to vector<64x1xf32>
    %cst_34 = arith.constant 1.280000e+02 : f32
    %79 = vector.broadcast %cst_34 : f32 to vector<64x1xf32>
    %80 = arith.divf %78, %79 : vector<64x1xf32>
    %cst_35 = arith.constant 9.99999974E-6 : f32
    %81 = vector.broadcast %cst_35 : f32 to vector<64x1xf32>
    %82 = arith.addf %80, %81 : vector<64x1xf32>
    %83 = math.rsqrt %82 : vector<64x1xf32>
    %84 = vector.broadcast %83 : vector<64x1xf32> to vector<64x128xf32>
    %85 = arith.mulf %75, %84 : vector<64x128xf32>
    %86 = arith.truncf %85 : vector<64x128xf32> to vector<64x128xbf16>
    %cst_36 = arith.constant dense<0.000000e+00> : vector<64x512xf32>
    %87 = tpu.matmul %86, %68, %cst_36 {dimension_numbers = #tpu.dot_dimension_numbers<[1], [0], [0], [1], [0, 0, 1, 1], [], []>} : vector<64x128xbf16>, vector<128x512xbf16>, vector<64x512xf32> -> vector<64x512xf32>
    %88 = vector.extract_strided_slice %87 {offsets = [0, 0], sizes = [64, 256], strides = [1, 1]} : vector<64x512xf32> to vector<64x256xf32>
    %89 = arith.negf %88 : vector<64x256xf32>
    %90 = math.exp %89 : vector<64x256xf32>
    %cst_37 = arith.constant 1.000000e+00 : f32
    %91 = vector.broadcast %cst_37 : f32 to vector<64x256xf32>
    %92 = arith.addf %91, %90 : vector<64x256xf32>
    %93 = arith.divf %91, %92 : vector<64x256xf32>
    %94 = arith.mulf %88, %93 : vector<64x256xf32>
    %95 = vector.extract_strided_slice %87 {offsets = [0, 256], sizes = [64, 256], strides = [1, 1]} : vector<64x512xf32> to vector<64x256xf32>
    %96 = arith.mulf %94, %95 : vector<64x256xf32>
    %97 = arith.truncf %96 : vector<64x256xf32> to vector<64x256xbf16>
    %cst_38 = arith.constant dense<0.000000e+00> : vector<64x128xf32>
    %98 = tpu.matmul %97, %69, %cst_38 {dimension_numbers = #tpu.dot_dimension_numbers<[1], [0], [0], [1], [0, 0, 1, 1], [], []>} : vector<64x256xbf16>, vector<256x128xbf16>, vector<64x128xf32> -> vector<64x128xf32>
    %99 = arith.addf %67, %98 : vector<64x128xf32>
    %c0_39 = arith.constant 0 : index
    %c0_40 = arith.constant 0 : index
    %100 = vector.load %arg9[%c0_39, %c0_40] : memref<64x128xf32, #tpu.memory_space<vmem>>, vector<64x128xf32>
    tpu.vector_store %arg9[%c0_39, %c0_40], %99 {strides = array<i32>} : memref<64x128xf32, #tpu.memory_space<vmem>>, vector<64x128xf32>,
    return
  }
  func.func @transform_0(%arg0: i32) -> (i32, i32) {
    %c0_i32 = arith.constant 0 : i32
    %c0_i32_0 = arith.constant 0 : i32
    return %arg0, %c0_i32 : i32, i32
  }
  func.func @transform_1(%arg0: i32) -> (i32, i32) {
    %c0_i32 = arith.constant 0 : i32
    %c0_i32_0 = arith.constant 0 : i32
    return %arg0, %c0_i32 : i32, i32
  }
  func.func @transform_2(%arg0: i32) -> (i32, i32) {
    %c0_i32 = arith.constant 0 : i32
    %c0_i32_0 = arith.constant 0 : i32
    %c0_i32_1 = arith.constant 0 : i32
    return %c0_i32, %c0_i32_0 : i32, i32
  }
  func.func @transform_3(%arg0: i32) -> (i32, i32) {
    %c0_i32 = arith.constant 0 : i32
    %c0_i32_0 = arith.constant 0 : i32
    %c0_i32_1 = arith.constant 0 : i32
    return %c0_i32, %c0_i32_0 : i32, i32
  }
  func.func @transform_4(%arg0: i32) -> (i32, i32) {
    %c0_i32 = arith.constant 0 : i32
    %c0_i32_0 = arith.constant 0 : i32
    %c0_i32_1 = arith.constant 0 : i32
    return %c0_i32, %c0_i32_0 : i32, i32
  }
  func.func @transform_5(%arg0: i32) -> (i32, i32) {
    %c0_i32 = arith.constant 0 : i32
    %c0_i32_0 = arith.constant 0 : i32
    %c0_i32_1 = arith.constant 0 : i32
    return %c0_i32, %c0_i32_0 : i32, i32
  }
  func.func @transform_6(%arg0: i32) -> (i32, i32) {
    %c0_i32 = arith.constant 0 : i32
    %c0_i32_0 = arith.constant 0 : i32
    %c0_i32_1 = arith.constant 0 : i32
    return %c0_i32, %c0_i32_0 : i32, i32
  }
  func.func @transform_7(%arg0: i32) -> (i32, i32) {
    %c0_i32 = arith.constant 0 : i32
    %c0_i32_0 = arith.constant 0 : i32
    %c0_i32_1 = arith.constant 0 : i32
    return %c0_i32, %c0_i32_0 : i32, i32
  }
  func.func @transform_8(%arg0: i32) -> (i32, i32) {
    %c0_i32 = arith.constant 0 : i32
    %c0_i32_0 = arith.constant 0 : i32
    return %arg0, %c0_i32 : i32, i32
  }
}

</mosaic_0001>

<bundles_post_ra>
// kernel: pair_conditioning.1
= control target key start
LH: loop header
LB: loop body
LE: loop exit
PB: predicated region body
PF: predicated region fallthrough
CT: control target
= control target key end

     0   :  { %13 = vsyncpa [#allocation3], 0  ;;  %s3910_s0 = inlined_call_operand.hbm [shape: f32[64,128], index: 0, kind: input, shape index: {}]   ;;  %s3911_s1 = inlined_call_operand.hbm [shape: f32[64,139], index: 1, kind: input, shape index: {}]   ;;  %s3912_s2 = inlined_call_operand.hbm [shape: bf16[128,128], index: 2, kind: input, shape index: {}]   ;;  %s3913_s3 = inlined_call_operand.hbm [shape: bf16[139,128], index: 3, kind: input, shape index: {}]   ;;  %s3914_s4 = inlined_call_operand.hbm [shape: bf16[128,512], index: 4, kind: input, shape index: {}]   ;;  %s3915_s5 = inlined_call_operand.hbm [shape: bf16[256,128], index: 5, kind: input, shape index: {}]   ;;  %s3916_s6 = inlined_call_operand.hbm [shape: bf16[128,512], index: 6, kind: input, shape index: {}]   ;;  %s3917_s7 = inlined_call_operand.hbm [shape: bf16[256,128], index: 7, kind: input, shape index: {}]   ;;  %s3918_s8 = inlined_call_operand.hbm [shape: f32[64,128], index: 8, kind: output, shape index: {}]  }
   0x1   :  { %14 = vsyncpa [#allocation6], 0 }
   0x2   :  { %15 = vsyncpa [#allocation9], 0 }
   0x3   :  { %16 = vsyncpa [#allocation12], 0 }
   0x4   :  { %17 = vsyncpa [#allocation15], 0 }
   0x5   :  { %18 = vsyncpa [#allocation4], 0  ;;  %s3054_s27 = smov [#allocation5]   ;;  %s2844_s9 = scalar_lea.hbm %s3911_s1, 2048 }
   0x6   :  { %s36_s28 = sshll.u32 %s3054_s27, 4  ;;  %p2845_p0 = scmp.ne.s32.totalorder %s3911_s1, %s2844_s9  ;;  %s37_s28 = int_to_ptr.vmem [resolvable:$true] %s36_s28 }
   0x7   :  { %p2848_p1 = scmp.lt.u32.totalorder %s2844_s9, %s3911_s1 }
   0x9   :  { %p2850_p2 = pnand %p2848_p1, %p2845_p0 }
   0xb   :  { %2853 = shalt.err (!%p2850_p2)
}
   0xc   :  { %s2854_s14 = scalar_lea.vmem %s37_s28, 2048  ;;  %p2859_p4 = scmp.lt.s32.totalorder %s37_s28, %s37_s28 }
   0xd   :  { %p2855_p3 = scmp.ne.s32.totalorder %s37_s28, %s2854_s14  ;;  %p2860_p5 = scmp.lt.s32.totalorder %s2854_s14, %s2854_s14 }
   0xf   :  { %p2861_p6 = por %p2860_p5, %p2859_p4 }
  0x11   :  { %p2862_p7 = pnand %p2861_p6, %p2855_p3 }
  0x13   :  { %2865 = shalt.err (!%p2862_p7)
}
  0x14   :  { %s3055_s15 = smov 256   ;;  %s3056_s16 = smov 16  }
  0x15   :  { %42 = dma.hbm_to_vmem [thread:$0]  %s3911_s1, 2048, %s37_s28, [#allocation6], %s3055_s15, %s3055_s15, %s3056_s16  }
  0x16   :  { %s3057_s19 = smov [#allocation8]   ;;  %s3058_s21 = smov [#allocation11]  }
  0x17   :  { %s60_s20 = sshll.u32 %s3057_s19, 4  ;;  %s84_s22 = sshll.u32 %s3058_s21, 4  ;;  %s61_s20 = int_to_ptr.vmem [resolvable:$true] %s60_s20  ;;  %s85_s22 = int_to_ptr.vmem [resolvable:$true] %s84_s22 }
  0x18   :  { %s2866_s25 = scalar_lea.hbm %s3913_s3, 1152 }
  0x19   :  { %p2867_p8 = scmp.ne.s32.totalorder %s3913_s3, %s2866_s25  ;;  %p2870_p9 = scmp.lt.u32.totalorder %s2866_s25, %s3913_s3 }
  0x1b   :  { %p2872_p10 = pnand %p2870_p9, %p2867_p8 }
  0x1d   :  { %2875 = shalt.err (!%p2872_p10)
}
  0x1e   :  { %s2876_s1 = scalar_lea.vmem %s61_s20, 1152  ;;  %p2881_p12 = scmp.lt.s32.totalorder %s61_s20, %s61_s20 }
  0x1f   :  { %p2877_p11 = scmp.ne.s32.totalorder %s61_s20, %s2876_s1  ;;  %p2882_p13 = scmp.lt.s32.totalorder %s2876_s1, %s2876_s1 }
  0x21   :  { %p2883_p0 = por %p2882_p13, %p2881_p12 }
  0x23   :  { %p2884_p1 = pnand %p2883_p0, %p2877_p11 }
  0x25   :  { %2887 = shalt.err (!%p2884_p1)
}
  0x26   :  { %s3059_s28 = smov 64   ;;  %s3060_s9 = smov 4  }
  0x27   :  { %66 = dma.hbm_to_vmem [thread:$0]  %s3913_s3, 1152, %s61_s20, [#allocation9], %s3059_s28, %s3059_s28, %s3060_s9  }
  0x28   :  { %s2888_s14 = scalar_lea.hbm %s3915_s5, 2048 }
  0x29   :  { %p2889_p2 = scmp.ne.s32.totalorder %s3915_s5, %s2888_s14  ;;  %p2892_p3 = scmp.lt.u32.totalorder %s2888_s14, %s3915_s5 }
  0x2b   :  { %p2894_p4 = pnand %p2892_p3, %p2889_p2 }
  0x2d   :  { %2897 = shalt.err (!%p2894_p4)
}
  0x2e   :  { %s2898_s23 = scalar_lea.vmem %s85_s22, 2048  ;;  %p2903_p6 = scmp.lt.s32.totalorder %s85_s22, %s85_s22 }
  0x2f   :  { %p2899_p5 = scmp.ne.s32.totalorder %s85_s22, %s2898_s23  ;;  %p2904_p7 = scmp.lt.s32.totalorder %s2898_s23, %s2898_s23 }
  0x31   :  { %p2905_p8 = por %p2904_p7, %p2903_p6 }
  0x33   :  { %p2906_p9 = pnand %p2905_p8, %p2899_p5 }
  0x35   :  { %2909 = shalt.err (!%p2906_p9)
}
  0x36   :  { %90 = dma.hbm_to_vmem [thread:$0]  %s3915_s5, 2048, %s85_s22, [#allocation12], %s3059_s28, %s3059_s28, %s3060_s9  }
  0x37   :  { %s3061_s24 = smov [#allocation2]   ;;  %s2910_s29 = scalar_lea.hbm %s3910_s0, 1024 }
  0x38   :  { %s24_s25 = sshll.u32 %s3061_s24, 4  ;;  %p2911_p10 = scmp.ne.s32.totalorder %s3910_s0, %s2910_s29  ;;  %s25_s25 = int_to_ptr.vmem [resolvable:$true] %s24_s25 }
  0x39   :  { %p2914_p11 = scmp.lt.u32.totalorder %s2910_s29, %s3910_s0 }
  0x3b   :  { %p2916_p12 = pnand %p2914_p11, %p2911_p10 }
  0x3d   :  { %2919 = shalt.err (!%p2916_p12)
}
  0x3e   :  { %s2920_s12 = scalar_lea.vmem %s25_s25, 1024  ;;  %p2925_p0 = scmp.lt.s32.totalorder %s25_s25, %s25_s25 }
  0x3f   :  { %p2921_p13 = scmp.ne.s32.totalorder %s25_s25, %s2920_s12  ;;  %p2926_p1 = scmp.lt.s32.totalorder %s2920_s12, %s2920_s12 }
  0x41   :  { %p2927_p2 = por %p2926_p1, %p2925_p0 }
  0x43   :  { %p2928_p3 = pnand %p2927_p2, %p2921_p13 }
  0x45   :  { %2931 = shalt.err (!%p2928_p3)
}
  0x46   :  { %s3062_s5 = smov 128   ;;  %s3063_s22 = smov 8  }
  0x47   :  { %30 = dma.hbm_to_vmem [thread:$0]  %s3910_s0, 1024, %s25_s25, [#allocation3], %s3062_s5, %s3062_s5, %s3063_s22  }
  0x48   :  { %s3064_s17 = smov [#allocation7]   ;;  %s3065_s19 = smov [#allocation10]  }
  0x49   :  { %s48_s18 = sshll.u32 %s3064_s17, 4  ;;  %s72_s21 = sshll.u32 %s3065_s19, 4  ;;  %s49_s18 = int_to_ptr.vmem [resolvable:$true] %s48_s18  ;;  %s3176_s21 = int_to_ptr.vmem [resolvable:$true] %s72_s21 }
  0x4a   :  { %s2932_s20 = scalar_lea.hbm %s3912_s2, 1024 }
  0x4b   :  { %p2933_p4 = scmp.ne.s32.totalorder %s3912_s2, %s2932_s20  ;;  %p2936_p5 = scmp.lt.u32.totalorder %s2932_s20, %s3912_s2 }
  0x4d   :  { %p2938_p6 = pnand %p2936_p5, %p2933_p4 }
  0x4f   :  { %2941 = shalt.err (!%p2938_p6)
}
  0x50   :  { %s2942_s0 = scalar_lea.vmem %s49_s18, 1024  ;;  %p2947_p8 = scmp.lt.s32.totalorder %s49_s18, %s49_s18 }
  0x51   :  { %p2943_p7 = scmp.ne.s32.totalorder %s49_s18, %s2942_s0  ;;  %p2948_p9 = scmp.lt.s32.totalorder %s2942_s0, %s2942_s0 }
  0x53   :  { %p2949_p10 = por %p2948_p9, %p2947_p8 }
  0x55   :  { %p2950_p11 = pnand %p2949_p10, %p2943_p7 }
  0x57   :  { %2953 = shalt.err (!%p2950_p11)
}
  0x58   :  { %54 = dma.hbm_to_vmem [thread:$0]  %s3912_s2, 1024, %s49_s18, [#allocation6], %s3059_s28, %s3059_s28, %s3060_s9  }
  0x59   :  { %s2954_s11 = scalar_lea.hbm %s3914_s4, 4096 }
  0x5a   :  { %p2955_p12 = scmp.ne.s32.totalorder %s3914_s4, %s2954_s11  ;;  %p2958_p13 = scmp.lt.u32.totalorder %s2954_s11, %s3914_s4 }
  0x5c   :  { %p2960_p0 = pnand %p2958_p13, %p2955_p12 }
  0x5e   :  { %2963 = shalt.err (!%p2960_p0)
}
  0x5f   :  { %s2964_s19 = scalar_lea.vmem %s3176_s21, 4096  ;;  %p2969_p2 = scmp.lt.s32.totalorder %s3176_s21, %s3176_s21 }
  0x60   :  { %p2965_p1 = scmp.ne.s32.totalorder %s3176_s21, %s2964_s19  ;;  %p2970_p3 = scmp.lt.s32.totalorder %s2964_s19, %s2964_s19 }
  0x62   :  { %p2971_p4 = por %p2970_p3, %p2969_p2 }
  0x64   :  { %p2972_p5 = pnand %p2971_p4, %p2965_p1 }
  0x66   :  { %2975 = shalt.err (!%p2972_p5)
}
  0x67   :  { %78 = dma.hbm_to_vmem [thread:$0]  %s3914_s4, 4096, %s3176_s21, [#allocation9], %s3055_s15, %s3055_s15, %s3056_s16  }
  0x68   :  { %s3066_s23 = smov [#allocation13]   ;;  %s3067_s20 = smov [#allocation14]  }
  0x69   :  { %s96_s3 = sshll.u32 %s3066_s23, 4  ;;  %s108_s24 = sshll.u32 %s3067_s20, 4  ;;  %s97_s3 = int_to_ptr.vmem [resolvable:$true] %s96_s3  ;;  %s3213_s24 = int_to_ptr.vmem [resolvable:$true] %s108_s24 }
  0x6a   :  { %s2976_s29 = scalar_lea.hbm %s3916_s6, 4096 }
  0x6b   :  { %p2977_p6 = scmp.ne.s32.totalorder %s3916_s6, %s2976_s29  ;;  %p2980_p7 = scmp.lt.u32.totalorder %s2976_s29, %s3916_s6 }
  0x6d   :  { %p2982_p8 = pnand %p2980_p7, %p2977_p6 }
  0x6f   :  { %2985 = shalt.err (!%p2982_p8)
}
  0x70   :  { %s2986_s4 = scalar_lea.vmem %s97_s3, 4096  ;;  %p2991_p10 = scmp.lt.s32.totalorder %s97_s3, %s97_s3 }
  0x71   :  { %p2987_p9 = scmp.ne.s32.totalorder %s97_s3, %s2986_s4  ;;  %p2992_p11 = scmp.lt.s32.totalorder %s2986_s4, %s2986_s4 }
  0x73   :  { %p2993_p12 = por %p2992_p11, %p2991_p10 }
  0x75   :  { %p2994_p13 = pnand %p2993_p12, %p2987_p9 }
  0x77   :  { %2997 = shalt.err (!%p2994_p13)
}
  0x78   :  { %102 = dma.hbm_to_vmem [thread:$0]  %s3916_s6, 4096, %s97_s3, [#allocation12], %s3055_s15, %s3055_s15, %s3056_s16  }
  0x79   :  { %s2998_s13 = scalar_lea.hbm %s3917_s7, 2048 }
  0x7a   :  { %p2999_p0 = scmp.ne.s32.totalorder %s3917_s7, %s2998_s13  ;;  %p3002_p1 = scmp.lt.u32.totalorder %s2998_s13, %s3917_s7 }
  0x7c   :  { %p3004_p2 = pnand %p3002_p1, %p2999_p0 }
  0x7e   :  { %3007 = shalt.err (!%p3004_p2)
}
  0x7f   :  { %s3008_s18 = scalar_lea.vmem %s3213_s24, 2048  ;;  %p3013_p4 = scmp.lt.s32.totalorder %s3213_s24, %s3213_s24 }
  0x80   :  { %p3009_p3 = scmp.ne.s32.totalorder %s3213_s24, %s3008_s18  ;;  %p3014_p5 = scmp.lt.s32.totalorder %s3008_s18, %s3008_s18 }
  0x82   :  { %p3015_p6 = por %p3014_p5, %p3013_p4 }
  0x84   :  { %p3016_p7 = pnand %p3015_p6, %p3009_p3 }
  0x86   :  { %3019 = shalt.err (!%p3016_p7)
}
  0x87   :  { %114 = dma.hbm_to_vmem [thread:$0]  %s3917_s7, 2048, %s3213_s24, [#allocation15], %s3059_s28, %s3059_s28, %s3060_s9  }
  0x88   :  { %3042 = dma.done.wait [#allocation3], 1024  }
  0x89   :  { %3043 = vsyncadd [#allocation3], 4294966272 }
  0x8a   :  { %3044 = dma.done.wait [#allocation6], 3072  }
  0x8b   :  { %3045 = vsyncadd [#allocation6], 4294964224 }
  0x8c   :  { %3046 = dma.done.wait [#allocation9], 5248  }
  0x8d   :  { %3047 = vsyncadd [#allocation9], 4294962048 }
  0x8e   :  { %3048 = dma.done.wait [#allocation12], 6144  }
  0x8f   :  { %3049 = vsyncadd [#allocation12], 4294961152 }
  0x90   :  { %3050 = dma.done.wait [#allocation15], 2048  }
  0x91   :  { %3051 = vsyncadd [#allocation15], 4294965248  ;;  %vm180_vm0 = vcmask 89088   ;;  %v3250_v0 = vld [vmem:[#allocation2 + $0x18] sm:$0xff]  ;;  %v3252_v1 = vld [vmem:[#allocation2] sm:$0xff]  ;;  %v3068_v41 = vmov 0  }
  0x92   :  { %v3254_v2 = vld [vmem:[#allocation5] sm:$0xff]  ;;  %170 = vadd.xlane.f32.xlu1 %v3250_v0  ;;  %164 = vadd.xlane.f32.xlu0 %v3252_v1  ;;  %v3258_v3 = vld [vmem:[#allocation5 + $0x8] sm:$0xff]  ;;  %v3264_v6 = vld [vmem:[#allocation5 + $0x10] sm:$0xff]  ;;  %vm492_vm1 = vcmask 1044480   ;;  %vm493_vm2 = vcmask 1045504   ;;  %s3070_s7 = smov [#allocation16]  }
  0x93   :  { %v181_v4 = vsel %vm180_vm0, %v3258_v3, 0.0  ;;  %v3262_v5 = vld [vmem:[#allocation2 + $0x8] sm:$0xff]  ;;  %v3266_v7 = vld [vmem:[#allocation5 + $0x18] sm:$0xff]  ;;  %v3281_v15 = vld [vmem:[#allocation2 + $0x10] sm:$0xff]  ;;  %499 = vmatprep.subr.bf16.mxu0 %v3068_v41  ;;  %s2225_s16 = sshll.u32 %s3070_s7, 4  ;;  %s2226_s16 = int_to_ptr.vmem [resolvable:$true] %s2225_s16 }
  0x94   :  { %v182_v8 = vadd.f32 %v181_v4, %v3254_v2  ;;  %v185_v9 = vsel %vm180_vm0, %v3266_v7, 0.0  ;;  %v3271_v10 = vld [vmem:[#allocation5 + $0x38] sm:$0xff]  ;;  %v3273_v11 = vld [vmem:[#allocation5 + $0x28] sm:$0xff]  ;;  %v3283_v16 = vld [vmem:[#allocation5 + $0x30] sm:$0xff]  ;;  %s3020_s28 = scalar_lea.vmem %s2226_s16, 1024  ;;  %p3025_p9 = scmp.lt.s32.totalorder %s2226_s16, %s2226_s16 }
  0x95   :  { %v186_v12 = vadd.f32 %v185_v9, %v3264_v6  ;;  %v3277_v13 = vld [vmem:[#allocation5 + $0x58] sm:$0xff]  ;;  %v3279_v14 = vld [vmem:[#allocation5 + $0x48] sm:$0xff]  ;;  %v193_v17 = vsel %vm180_vm0, %v3271_v10, 0.0  ;;  %v3287_v18 = vld [vmem:[#allocation5 + $0x20] sm:$0xff]  ;;  %v189_v19 = vsel %vm180_vm0, %v3273_v11, 0.0  ;;  %p3021_p8 = scmp.ne.s32.totalorder %s2226_s16, %s3020_s28  ;;  %p3026_p10 = scmp.lt.s32.totalorder %s3020_s28, %s3020_s28 }
  0x96   :  { %183 = vadd.xlane.f32.xlu1 %v182_v8  ;;  %166 = vadd.xlane.f32.xlu0 %v3262_v5  ;;  %v201_v20 = vsel %vm180_vm0, %v3277_v13, 0.0  ;;  %v197_v21 = vsel %vm180_vm0, %v3279_v14, 0.0  ;;  %v194_v22 = vadd.f32 %v193_v17, %v3283_v16  ;;  %v190_v23 = vadd.f32 %v189_v19, %v3287_v18  ;;  %v3298_v24 = vld [vmem:[#allocation2 + $0x28] sm:$0xff]  ;;  %v3300_v25 = vld [vmem:[#allocation2 + $0x20] sm:$0xff]  ;;  %v3302_v26 = vld [vmem:[#allocation5 + $0x50] sm:$0xff] }
  0x97   :  { %v3304_v27 = vld [vmem:[#allocation5 + $0x40] sm:$0xff]  ;;  %v202_v28 = vadd.f32 %v201_v20, %v3302_v26  ;;  %v3310_v30 = vld [vmem:[#allocation5 + $0x78] sm:$0xff]  ;;  %v3312_v31 = vld [vmem:[#allocation5 + $0x68] sm:$0xff]  ;;  %p3027_p11 = por %p3026_p10, %p3025_p9 }
  0x98   :  { %v198_v29 = vadd.f32 %v197_v21, %v3304_v27  ;;  %v3314_v32 = vld [vmem:[#allocation2 + $0x38] sm:$0xff]  ;;  %v3316_v33 = vld [vmem:[#allocation2 + $0x30] sm:$0xff]  ;;  %v3320_v35 = vld [vmem:[#allocation5 + $0x60] sm:$0xff]  ;;  %v209_v36 = vsel %vm180_vm0, %v3310_v30, 0.0  ;;  %v205_v37 = vsel %vm180_vm0, %v3312_v31, 0.0 }
  0x99   :  { %v3318_v34 = vld [vmem:[#allocation5 + $0x70] sm:$0xff]  ;;  %v206_v39 = vadd.f32 %v205_v37, %v3320_v35  ;;  %v2523_v40 = vld [vmem:[#allocation8] sm:$0xff]   ;;  %p3028_p12 = pnand %p3027_p11, %p3021_p8 }
  0x9a   :  { %187 = vadd.xlane.f32.xlu1 %v186_v12  ;;  %168 = vadd.xlane.f32.xlu0 %v3281_v15  ;;  %v210_v38 = vadd.f32 %v209_v36, %v3318_v34 }
  0x9b   :  { %500 = vmatpush1.bf16.msra.mxu0 %v2523_v40 }
  0x9c   :  { %501 = vmatprep.subr.bf16.mxu0 %v3068_v41 }
  0x9e   :  { %195 = vadd.xlane.f32.xlu1 %v194_v22  ;;  %191 = vadd.xlane.f32.xlu0 %v190_v23 }
  0xa2   :  { %174 = vadd.xlane.f32.xlu1 %v3298_v24  ;;  %172 = vadd.xlane.f32.xlu0 %v3300_v25 }
  0xa6   :  { %203 = vadd.xlane.f32.xlu1 %v202_v28  ;;  %199 = vadd.xlane.f32.xlu0 %v198_v29 }
  0xaa   :  { %178 = vadd.xlane.f32.xlu1 %v3314_v32  ;;  %176 = vadd.xlane.f32.xlu0 %v3316_v33 }
  0xae   :  { %211 = vadd.xlane.f32.xlu1 %v210_v38  ;;  %207 = vadd.xlane.f32.xlu0 %v206_v39 }
 0x11f   :  { %v171_v42 = vpop.xlane.xlu1 %170  ;;  %v165_v43 = vpop.xlane.xlu0 %164 }
 0x123   :  { %v184_v44 = vpop.xlane.xlu1 %183  ;;  %v167_v45 = vpop.xlane.xlu0 %166 }
 0x124   :  { %v213_v46 = vadd.f32 %v184_v44, %v165_v43 }
 0x126   :  { %v221_v47 = vmul.f32 0.0037453184, %v213_v46 }
 0x127   :  { %v188_v48 = vpop.xlane.xlu1 %187  ;;  %v169_v49 = vpop.xlane.xlu0 %168 }
 0x128   :  { %v214_v50 = vadd.f32 %v188_v48, %v167_v45  ;;  %v3333_v51 = vsub.f32 %v3252_v1, %v221_v47  ;;  %v3336_v52 = vsub.f32 %v3258_v3, %v221_v47  ;;  %v3350_v62 = vsub.f32 %v3254_v2, %v221_v47  ;;  %v2524_v47 = vld [vmem:[#allocation8 + $0x8] sm:$0xff]  }
 0x129   :  { %502 = vmatpush1.bf16.msra.mxu0 %v2524_v47  ;;  %v2535_v47 = vld [vmem:[#allocation7 + $0x28] sm:$0xff]  }
 0x12a   :  { %v222_v53 = vmul.f32 0.0037453184, %v214_v50  ;;  %v253_v54 = vmul.f32 %v3333_v51, %v3333_v51  ;;  %v278_v63 = vmul.f32 %v3336_v52, %v3336_v52  ;;  %v277_v20 = vmul.f32 %v3350_v62, %v3350_v62  ;;  %503 = vmatprep.subr.bf16.mxu0 %v3068_v41 }
 0x12b   :  { %v196_v55 = vpop.xlane.xlu1 %195  ;;  %v192_v56 = vpop.xlane.xlu0 %191 }
 0x12c   :  { %v3341_v57 = vsub.f32 %v3266_v7, %v222_v53  ;;  %v216_v58 = vadd.f32 %v196_v55, %v171_v42  ;;  %v215_v59 = vadd.f32 %v192_v56, %v169_v49  ;;  %261 = vadd.xlane.f32.xlu0 %v253_v54  ;;  %v3344_v60 = vsub.f32 %v3262_v5, %v222_v53 }
 0x12d   :  { %v3347_v61 = vsub.f32 %v3264_v6, %v222_v53 }
 0x12e   :  { %v224_v1 = vmul.f32 0.0037453184, %v216_v58  ;;  %v223_v3 = vmul.f32 0.0037453184, %v215_v59  ;;  %v254_v4 = vmul.f32 %v3344_v60, %v3344_v60  ;;  %v280_v7 = vmul.f32 %v3341_v57, %v3341_v57 }
 0x12f   :  { %v175_v8 = vpop.xlane.xlu1 %174  ;;  %v173_v5 = vpop.xlane.xlu0 %172  ;;  %v279_v17 = vmul.f32 %v3347_v61, %v3347_v61 }
 0x130   :  { %v3359_v9 = vsub.f32 %v3271_v10, %v224_v1  ;;  %v3362_v6 = vsub.f32 %v3273_v11, %v223_v3  ;;  %263 = vadd.xlane.f32.xlu1 %v254_v4  ;;  %v3365_v2 = vsub.f32 %v3250_v0, %v224_v1  ;;  %v3368_v12 = vsub.f32 %v3281_v15, %v223_v3 }
 0x131   :  { %v297_v19 = vsel %vm180_vm0, %v280_v7, 0.0  ;;  %v293_v10 = vsel %vm180_vm0, %v278_v63, 0.0  ;;  %v3381_v21 = vsub.f32 %v3283_v16, %v224_v1  ;;  %v3384_v15 = vsub.f32 %v3287_v18, %v223_v3 }
 0x132   :  { %v256_v11 = vmul.f32 %v3365_v2, %v3365_v2  ;;  %v255_v0 = vmul.f32 %v3368_v12, %v3368_v12  ;;  %v284_v28 = vmul.f32 %v3359_v9, %v3359_v9  ;;  %v282_v29 = vmul.f32 %v3362_v6, %v3362_v6 }
 0x133   :  { %v204_v22 = vpop.xlane.xlu1 %203  ;;  %v200_v23 = vpop.xlane.xlu0 %199  ;;  %v298_v38 = vadd.f32 %v297_v19, %v279_v17  ;;  %v294_v39 = vadd.f32 %v293_v10, %v277_v20  ;;  %v283_v18 = vmul.f32 %v3381_v21, %v3381_v21  ;;  %v281_v42 = vmul.f32 %v3384_v15, %v3384_v15  ;;  %v2527_v20 = vld [vmem:[#allocation7 + $0x8] sm:$0xff]   ;;  %v2528_v10 = vld [vmem:[#allocation8 + $0x18] sm:$0xff]  }
 0x134   :  { %v218_v36 = vadd.f32 %v204_v22, %v175_v8  ;;  %v217_v37 = vadd.f32 %v200_v23, %v173_v5  ;;  %267 = vadd.xlane.f32.xlu1 %v256_v11  ;;  %265 = vadd.xlane.f32.xlu0 %v255_v0  ;;  %v305_v45 = vsel %vm180_vm0, %v284_v28, 0.0  ;;  %v301_v46 = vsel %vm180_vm0, %v282_v29, 0.0 }
 0x135   :  { %v306_v48 = vadd.f32 %v305_v45, %v283_v18  ;;  %v302_v49 = vadd.f32 %v301_v46, %v281_v42  ;;  %v2533_v45 = vld [vmem:[#allocation7 + $0x20] sm:$0xff]   ;;  %v2534_v46 = vld [vmem:[#allocation8 + $0x30] sm:$0xff]  }
 0x136   :  { %v226_v40 = vmul.f32 0.0037453184, %v218_v36  ;;  %v225_v16 = vmul.f32 0.0037453184, %v217_v37 }
 0x137   :  { %v179_v43 = vpop.xlane.xlu1 %178  ;;  %v177_v44 = vpop.xlane.xlu0 %176 }
 0x138   :  { %299 = vadd.xlane.f32.xlu1 %v298_v38  ;;  %295 = vadd.xlane.f32.xlu0 %v294_v39  ;;  %v3397_v50 = vsub.f32 %v3298_v24, %v226_v40  ;;  %v3400_v53 = vsub.f32 %v3300_v25, %v225_v16  ;;  %v3403_v54 = vsub.f32 %v3277_v13, %v226_v40  ;;  %v2525_v25 = vld [vmem:[#allocation7] sm:$0xff]   ;;  %v2526_v13 = vld [vmem:[#allocation8 + $0x10] sm:$0xff]  }
 0x139   :  { %v3406_v55 = vsub.f32 %v3279_v14, %v225_v16  ;;  %v3409_v1 = vsub.f32 %v3302_v26, %v226_v40  ;;  %v3412_v24 = vsub.f32 %v3304_v27, %v225_v16  ;;  %2482 = vmatprep.subr.bf16.mxu1 %v2525_v25  ;;  %504 = vmatpush1.bf16.msra.mxu0 %v2526_v13  ;;  %v2529_v39 = vld [vmem:[#allocation7 + $0x10] sm:$0xff]   ;;  %v2530_v16 = vld [vmem:[#allocation8 + $0x20] sm:$0xff]   ;;  %v2539_v13 = vld [vmem:[#allocation7 + $0x38] sm:$0xff]  }
 0x13a   :  { %v258_v4 = vmul.f32 %v3397_v50, %v3397_v50  ;;  %v257_v7 = vmul.f32 %v3400_v53, %v3400_v53  ;;  %v288_v8 = vmul.f32 %v3403_v54, %v3403_v54  ;;  %2483 = vmatpush3.bf16.msra.mxu1 %v2525_v25  ;;  %505 = vmatprep.subr.bf16.mxu0 %v3068_v41 }
 0x13b   :  { %v212_v56 = vpop.xlane.xlu1 %211  ;;  %v208_v58 = vpop.xlane.xlu0 %207  ;;  %v286_v26 = vmul.f32 %v3406_v55, %v3406_v55  ;;  %v285_v11 = vmul.f32 %v3412_v24, %v3412_v24  ;;  %2484 = vmatprep.subr.bf16.mxu1 %v2527_v20 }
 0x13c   :  { %v220_v59 = vadd.f32 %v212_v56, %v179_v43  ;;  %v219_v63 = vadd.f32 %v208_v58, %v177_v44  ;;  %307 = vadd.xlane.f32.xlu1 %v306_v48  ;;  %303 = vadd.xlane.f32.xlu0 %v302_v49  ;;  %v313_v0 = vsel %vm180_vm0, %v288_v8, 0.0  ;;  %v2531_v43 = vld [vmem:[#allocation7 + $0x18] sm:$0xff]   ;;  %v2532_v44 = vld [vmem:[#allocation8 + $0x28] sm:$0xff]   ;;  %v2537_v49 = vld [vmem:[#allocation7 + $0x30] sm:$0xff]   ;;  %v3069_v58 = vmov 65535  }
 0x13d   :  { %506 = vmatpush1.bf16.msra.mxu0 %v2528_v10  ;;  %v309_v28 = vsel %vm180_vm0, %v286_v26, 0.0  ;;  %v2536_v48 = vld [vmem:[#allocation8 + $0x38] sm:$0xff]   ;;  %v2538_v56 = vld [vmem:[#allocation8 + $0x40] sm:$0x3f]  }
 0x13e   :  { %v228_v3 = vmul.f32 0.0037453184, %v220_v59  ;;  %v227_v14 = vmul.f32 0.0037453184, %v219_v63  ;;  %507 = vmatprep.subr.bf16.mxu0 %v3068_v41  ;;  %2485 = vmatpush3.bf16.msra.mxu1 %v2527_v20  ;;  %v310_v37 = vadd.f32 %v309_v28, %v285_v11  ;;  %v494_v59 = vsel %vm492_vm1, 4294967295, %v3069_v58 }
 0x13f   :  { %2486 = vmatprep.subr.bf16.mxu1 %v2529_v39  ;;  %v495_v63 = vsel %vm493_vm2, %v494_v59, 0 }
 0x140   :  { %v3424_v27 = vsub.f32 %v3310_v30, %v228_v3  ;;  %v3427_v5 = vsub.f32 %v3312_v31, %v227_v14  ;;  %271 = vadd.xlane.f32.xlu1 %v258_v4  ;;  %269 = vadd.xlane.f32.xlu0 %v257_v7  ;;  %v3430_v17 = vsub.f32 %v3314_v32, %v228_v3 }
 0x141   :  { %v3433_v19 = vsub.f32 %v3316_v33, %v227_v14  ;;  %v287_v31 = vmul.f32 %v3409_v1, %v3409_v1  ;;  %v3443_v32 = vsub.f32 %v3318_v34, %v228_v3  ;;  %v3451_v23 = vsub.f32 %v3320_v35, %v227_v14  ;;  %508 = vmatpush1.bf16.msra.mxu0 %v2530_v16 }
 0x142   :  { %v260_v30 = vmul.f32 %v3430_v17, %v3430_v17  ;;  %v292_v22 = vmul.f32 %v3424_v27, %v3424_v27  ;;  %v290_v34 = vmul.f32 %v3427_v5, %v3427_v5  ;;  %2487 = vmatpush3.bf16.msra.mxu1 %v2529_v39  ;;  %509 = vmatprep.subr.bf16.mxu0 %v3068_v41 }
 0x143   :  { %v259_v33 = vmul.f32 %v3433_v19, %v3433_v19  ;;  %v314_v29 = vadd.f32 %v313_v0, %v287_v31  ;;  %v291_v36 = vmul.f32 %v3443_v32, %v3443_v32  ;;  %v289_v38 = vmul.f32 %v3451_v23, %v3451_v23  ;;  %2488 = vmatprep.subr.bf16.mxu1 %v2531_v43 }
 0x144   :  { %275 = vadd.xlane.f32.xlu1 %v260_v30  ;;  %v321_v35 = vsel %vm180_vm0, %v292_v22, 0.0  ;;  %v317_v40 = vsel %vm180_vm0, %v290_v34, 0.0  ;;  %v497_v25 = vand.u32 %v2538_v56, %v495_v63 }
 0x145   :  { %273 = vadd.xlane.f32.xlu0 %v259_v33  ;;  %v322_v18 = vadd.f32 %v321_v35, %v291_v36  ;;  %v318_v42 = vadd.f32 %v317_v40, %v289_v38  ;;  %510 = vmatpush1.bf16.msra.mxu0 %v2532_v44 }
 0x146   :  { %2489 = vmatpush3.bf16.msra.mxu1 %v2531_v43  ;;  %511 = vmatprep.subr.bf16.mxu0 %v3068_v41 }
 0x147   :  { %2490 = vmatprep.subr.bf16.mxu1 %v2533_v45 }
 0x148   :  { %315 = vadd.xlane.f32.xlu1 %v314_v29 }
 0x149   :  { %311 = vadd.xlane.f32.xlu0 %v310_v37  ;;  %512 = vmatpush1.bf16.msra.mxu0 %v2534_v46 }
 0x14a   :  { %2491 = vmatpush3.bf16.msra.mxu1 %v2533_v45  ;;  %513 = vmatprep.subr.bf16.mxu0 %v3068_v41 }
 0x14b   :  { %2492 = vmatprep.subr.bf16.mxu1 %v2535_v47 }
 0x14c   :  { %323 = vadd.xlane.f32.xlu1 %v322_v18 }
 0x14d   :  { %319 = vadd.xlane.f32.xlu0 %v318_v42  ;;  %514 = vmatpush1.bf16.msra.mxu0 %v2536_v48 }
 0x14e   :  { %2493 = vmatpush3.bf16.msra.mxu1 %v2535_v47  ;;  %515 = vmatprep.subr.bf16.mxu0 %v3068_v41 }
 0x14f   :  { %2494 = vmatprep.subr.bf16.mxu1 %v2537_v49 }
 0x151   :  { %516 = vmatpush1.bf16.msra.mxu0 %v497_v25 }
 0x152   :  { %2495 = vmatpush3.bf16.msra.mxu1 %v2537_v49 }
 0x153   :  { %2496 = vmatprep.subr.bf16.mxu1 %v2539_v13 }
 0x156   :  { %2497 = vmatpush3.bf16.msra.mxu1 %v2539_v13 }
 0x1b9   :  { %v262_v3 = vpop.xlane.xlu0 %261 }
 0x1bd   :  { %v264_v14 = vpop.xlane.xlu1 %263 }
 0x1c1   :  { %v268_v4 = vpop.xlane.xlu1 %267  ;;  %v266_v7 = vpop.xlane.xlu0 %265 }
 0x1c5   :  { %v300_v8 = vpop.xlane.xlu1 %299  ;;  %v296_v26 = vpop.xlane.xlu0 %295 }
 0x1c6   :  { %v326_v20 = vadd.f32 %v300_v8, %v264_v14  ;;  %v325_v10 = vadd.f32 %v296_v26, %v262_v3 }
 0x1c8   :  { %v334_v30 = vmul.f32 0.0037453184, %v326_v20  ;;  %v333_v31 = vmul.f32 0.0037453184, %v325_v10 }
 0x1c9   :  { %v308_v11 = vpop.xlane.xlu1 %307  ;;  %v304_v33 = vpop.xlane.xlu0 %303 }
 0x1ca   :  { %v342_v0 = vadd.f32 1e-05, %v334_v30  ;;  %v341_v22 = vadd.f32 1e-05, %v333_v31  ;;  %v328_v28 = vadd.f32 %v308_v11, %v268_v4  ;;  %v327_v34 = vadd.f32 %v304_v33, %v266_v7 }
 0x1cc   :  { %2668 = vrsqrt.f32 %v342_v0  ;;  %v336_v29 = vmul.f32 0.0037453184, %v328_v28  ;;  %v335_v36 = vmul.f32 0.0037453184, %v327_v34 }
 0x1cd   :  { %2670 = vrsqrt.f32 %v341_v22  ;;  %v272_v37 = vpop.xlane.xlu1 %271  ;;  %v270_v35 = vpop.xlane.xlu0 %269 }
 0x1ce   :  { %v344_v38 = vadd.f32 1e-05, %v336_v29  ;;  %v343_v39 = vadd.f32 1e-05, %v335_v36 }
 0x1d0   :  { %2672 = vrsqrt.f32 %v344_v38 }
 0x1d1   :  { %2674 = vrsqrt.f32 %v343_v39  ;;  %v276_v40 = vpop.xlane.xlu1 %275 }
 0x1d2   :  { %v274_v16 = vpop.xlane.xlu0 %273 }
 0x1d5   :  { %v316_v18 = vpop.xlane.xlu1 %315 }
 0x1d6   :  { %v2669_v42 = vpop.eup %2668  ;;  %v330_v43 = vadd.f32 %v316_v18, %v272_v37  ;;  %v312_v44 = vpop.xlane.xlu0 %311 }
 0x1d7   :  { %v2671_v45 = vpop.eup %2670  ;;  %v329_v46 = vadd.f32 %v312_v44, %v270_v35  ;;  %v372_v47 = vmul.f32 %v2669_v42, %v3341_v57  ;;  %v358_v48 = vmul.f32 %v2669_v42, %v3344_v60  ;;  %v371_v49 = vmul.f32 %v2669_v42, %v3347_v61 }
 0x1d8   :  { %v338_v56 = vmul.f32 0.0037453184, %v330_v43  ;;  %v370_v58 = vmul.f32 %v2671_v45, %v3336_v52  ;;  %v357_v59 = vmul.f32 %v2671_v45, %v3333_v51  ;;  %v369_v63 = vmul.f32 %v2671_v45, %v3350_v62 }
 0x1d9   :  { %v337_v25 = vmul.f32 0.0037453184, %v329_v46  ;;  %v324_v13 = vpop.xlane.xlu1 %323 }
 0x1da   :  { %v2673_v3 = vpop.eup %2672  ;;  %v346_v14 = vadd.f32 1e-05, %v338_v56  ;;  %v332_v4 = vadd.f32 %v324_v13, %v276_v40  ;;  %v320_v7 = vpop.xlane.xlu0 %319  ;;  %v386_v8 = vpack.c.bf16 %v372_v47, %v370_v58  ;;  %v365_v26 = vpack.c.bf16 %v358_v48, %v357_v59 }
 0x1db   :  { %v2675_v57 = vpop.eup %2674  ;;  %v345_v20 = vadd.f32 1e-05, %v337_v25  ;;  %v331_v60 = vadd.f32 %v320_v7, %v274_v16  ;;  %v385_v10 = vpack.c.bf16 %v371_v49, %v369_v63  ;;  %v376_v61 = vmul.f32 %v2673_v3, %v3359_v9 }
 0x1dc   :  { %2676 = vrsqrt.f32 %v346_v14  ;;  %v340_v52 = vmul.f32 0.0037453184, %v332_v4  ;;  %2250 = vmatprep.mubr.msk.bf16.mxu0 %vm180_vm0, %v386_v8  ;;  %2498 = vmatprep.mubr.bf16.mxu1 %v365_v26  ;;  %v374_v51 = vmul.f32 %v2675_v57, %v3362_v6  ;;  %v359_v62 = vmul.f32 %v2675_v57, %v3368_v12 }
 0x1dd   :  { %2678 = vrsqrt.f32 %v345_v20  ;;  %v339_v30 = vmul.f32 0.0037453184, %v331_v60  ;;  %532 = vmatmul.mubr.bf16.vlgmr.msra.gmra.mrb[0].mxu0 %v385_v10  ;;  %v360_v31 = vmul.f32 %v2673_v3, %v3365_v2  ;;  %v373_v9 = vmul.f32 %v2675_v57, %v3384_v15 }
 0x1de   :  { %v348_v11 = vadd.f32 1e-05, %v340_v52  ;;  %v388_v33 = vpack.c.bf16 %v376_v61, %v374_v51  ;;  %v375_v28 = vmul.f32 %v2673_v3, %v3381_v21 }
 0x1df   :  { %v347_v0 = vadd.f32 1e-05, %v339_v30  ;;  %v366_v22 = vpack.c.bf16 %v360_v31, %v359_v62  ;;  %v2540_v30 = vld [vmem:[#allocation10] ss:$16 sps:$4 sm:$0xff]   ;;  %v2542_v31 = vld [vmem:[#allocation10 + $0x4] ss:$16 sps:$4 sm:$0xff]  }
 0x1e0   :  { %2680 = vrsqrt.f32 %v348_v11  ;;  %2251 = vmatprep.mubr.msk.bf16.mxu0 %vm180_vm0, %v388_v33  ;;  %v387_v6 = vpack.c.bf16 %v375_v28, %v373_v9  ;;  %v2543_v11 = vld [vmem:[#allocation10 + $0x8] ss:$16 sps:$4 sm:$0xff]   ;;  %v2545_v33 = vld [vmem:[#allocation10 + $0xc] ss:$16 sps:$4 sm:$0xff]   ;;  %994 = vmatprep.subr.bf16.mxu1 %v2542_v31  ;;  %v2546_v9 = vld [vmem:[#allocation10 + $0x20] ss:$16 sps:$4 sm:$0xff]  }
 0x1e1   :  { %2682 = vrsqrt.f32 %v347_v0  ;;  %2499 = vmatmul.mubr.bf16.vlgmr.msra.gmra.mrb[0].mxu1 %v366_v22  ;;  %v2548_v0 = vld [vmem:[#allocation10 + $0x24] ss:$16 sps:$4 sm:$0xff]   ;;  %v2551_v22 = vld [vmem:[#allocation10 + $0x2c] ss:$16 sps:$4 sm:$0xff]   ;;  %1067 = vmatprep.subr.bf16.mxu0 %v2545_v33  ;;  %v2549_v28 = vld [vmem:[#allocation10 + $0x28] ss:$16 sps:$4 sm:$0xff]  }
 0x1e2   :  { %995 = vmatpush1.bf16.msra.mxu1 %v2540_v30  ;;  %1068 = vmatpush1.bf16.msra.mxu0 %v2543_v11  ;;  %v2573_v30 = vld [vmem:[#allocation10 + $0xa8] ss:$16 sps:$4 sm:$0xff]   ;;  %v2578_v31 = vld [vmem:[#allocation10 + $0xc4] ss:$16 sps:$4 sm:$0xff]   ;;  %v2581_v11 = vld [vmem:[#allocation10 + $0xcc] ss:$16 sps:$4 sm:$0xff]  }
 0x1e3   :  { %996 = vmatprep.subr.bf16.mxu1 %v2548_v0  ;;  %1069 = vmatprep.subr.bf16.mxu0 %v2551_v22  ;;  %v2576_v33 = vld [vmem:[#allocation10 + $0xc0] ss:$16 sps:$4 sm:$0xff]   ;;  %v2579_v0 = vld [vmem:[#allocation10 + $0xc8] ss:$16 sps:$4 sm:$0xff]   ;;  %v2584_v22 = vld [vmem:[#allocation10 + $0xe4] ss:$16 sps:$4 sm:$0xff]  }
 0x1e5   :  { %540 = vmatmul.mubr.bf16.gmra.mrb[4].mxu0 %v387_v6  ;;  %v2554_v6 = vld [vmem:[#allocation10 + $0x44] ss:$16 sps:$4 sm:$0xff]  }
 0x1e6   :  { %v2677_v12 = vpop.eup %2676  ;;  %997 = vmatpush1.bf16.msra.mxu1 %v2546_v9  ;;  %1070 = vmatpush1.bf16.msra.mxu0 %v2549_v28  ;;  %v2587_v9 = vld [vmem:[#allocation10 + $0xec] ss:$16 sps:$4 sm:$0xff]   ;;  %v2582_v28 = vld [vmem:[#allocation10 + $0xe0] ss:$16 sps:$4 sm:$0xff]  }
 0x1e7   :  { %v2679_v34 = vpop.eup %2678  ;;  %v380_v29 = vmul.f32 %v2677_v12, %v3403_v54  ;;  %v362_v2 = vmul.f32 %v2677_v12, %v3397_v50  ;;  %v379_v36 = vmul.f32 %v2677_v12, %v3409_v1  ;;  %v2557_v12 = vld [vmem:[#allocation10 + $0x4c] ss:$16 sps:$4 sm:$0xff]   ;;  %998 = vmatprep.subr.bf16.mxu1 %v2554_v6  ;;  %v2585_v6 = vld [vmem:[#allocation10 + $0xe8] ss:$16 sps:$4 sm:$0xff]  }
 0x1e8   :  { %v378_v37 = vmul.f32 %v2679_v34, %v3406_v55  ;;  %v361_v15 = vmul.f32 %v2679_v34, %v3400_v53  ;;  %v377_v21 = vmul.f32 %v2679_v34, %v3412_v24  ;;  %v2552_v34 = vld [vmem:[#allocation10 + $0x40] ss:$16 sps:$4 sm:$0xff]   ;;  %1071 = vmatprep.subr.bf16.mxu0 %v2557_v12 }
 0x1ea   :  { %v2681_v35 = vpop.eup %2680  ;;  %v390_v38 = vpack.c.bf16 %v380_v29, %v378_v37  ;;  %v367_v39 = vpack.c.bf16 %v362_v2, %v361_v15  ;;  %v389_v40 = vpack.c.bf16 %v379_v36, %v377_v21  ;;  %v2555_v29 = vld [vmem:[#allocation10 + $0x48] ss:$16 sps:$4 sm:$0xff]   ;;  %999 = vmatpush1.bf16.msra.mxu1 %v2552_v34 }
 0x1eb   :  { %v2683_v16 = vpop.eup %2682  ;;  %v384_v18 = vmul.f32 %v2681_v35, %v3424_v27  ;;  %v364_v42 = vmul.f32 %v2681_v35, %v3430_v17  ;;  %v383_v24 = vmul.f32 %v2681_v35, %v3443_v32  ;;  %1072 = vmatpush1.bf16.msra.mxu0 %v2555_v29 }
 0x1ec   :  { %2252 = vmatprep.mubr.msk.bf16.mxu0 %vm180_vm0, %v390_v38  ;;  %2502 = vmatprep.mubr.bf16.mxu1 %v367_v39  ;;  %v382_v50 = vmul.f32 %v2683_v16, %v3427_v5  ;;  %v363_v54 = vmul.f32 %v2683_v16, %v3433_v19  ;;  %v381_v1 = vmul.f32 %v2683_v16, %v3451_v23 }
 0x1ed   :  { %548 = vmatmul.mubr.bf16.gmra.mrb[8].mxu0 %v389_v40 }
 0x1ee   :  { %v392_v53 = vpack.c.bf16 %v384_v18, %v382_v50  ;;  %v368_v55 = vpack.c.bf16 %v364_v42, %v363_v54  ;;  %v391_v27 = vpack.c.bf16 %v383_v24, %v381_v1 }
 0x1f0   :  { %2253 = vmatprep.mubr.msk.bf16.mxu0 %vm180_vm0, %v392_v53  ;;  %2503 = vmatmul.mubr.bf16.gmra.mrb[4].mxu1 %v368_v55 }
 0x1f1   :  { %1026 = vmatprep.mubr.bf16.mxu1 %v3068_v41 }
 0x1f5   :  { %556 = vmatmul.mubr.bf16.gmra.mrb[12].mxu0 %v391_v27 }
 0x1f6   :  { %1099 = vmatprep.mubr.bf16.mxu0 %v3068_v41 }
 0x2b0   :  { %v533_v17 = vpop.f32.mrb[0].mxu0 }
 0x2b1   :  { %v535_v5 = vpop.f32.mrb[1].mxu0 }
 0x2b2   :  { %v536_v43 = vpop.f32.mrb[2].mxu0 }
 0x2b3   :  { %v538_v19 = vpop.f32.mrb[3].mxu0 }
 0x2b4   :  { %v2500_v44 = vpop.f32.mrb[0].mxu1 }
 0x2b5   :  { %v646_v45 = vpop.f32.mrb[1].mxu1 }
 0x2b6   :  { %v3497_v46 = vadd.f32 %v646_v45, %v533_v17  ;;  %v2501_v23 = vpop.f32.mrb[2].mxu1 }
 0x2b7   :  { %v649_v47 = vpop.f32.mrb[3].mxu1 }
 0x2b8   :  { %v3499_v32 = vadd.f32 %v649_v47, %v536_v43  ;;  %741 = vadd.xlane.f32.xlu0 %v3497_v46  ;;  %v541_v48 = vpop.f32.mrb[4].mxu0  ;;  %v2560_v47 = vld [vmem:[#allocation10 + $0x64] ss:$16 sps:$4 sm:$0xff]  }
 0x2b9   :  { %v3502_v49 = vadd.f32 %v2500_v44, %v541_v48  ;;  %v543_v56 = vpop.f32.mrb[5].mxu0  ;;  %v2563_v48 = vld [vmem:[#allocation10 + $0x6c] ss:$16 sps:$4 sm:$0xff]   ;;  %1000 = vmatprep.subr.bf16.mxu1 %v2560_v47 }
 0x2ba   :  { %743 = vadd.xlane.f32.xlu1 %v3499_v32  ;;  %v544_v58 = vpop.f32.mrb[6].mxu0  ;;  %1073 = vmatprep.subr.bf16.mxu0 %v2563_v48 }
 0x2bb   :  { %v3505_v59 = vadd.f32 %v2501_v23, %v544_v58  ;;  %v546_v63 = vpop.f32.mrb[7].mxu0 }
 0x2bc   :  { %745 = vadd.xlane.f32.xlu0 %v3502_v49 }
 0x2be   :  { %747 = vadd.xlane.f32.xlu1 %v3505_v59 }
 0x2c0   :  { %v549_v25 = vpop.f32.mrb[8].mxu0 }
 0x2c1   :  { %v551_v13 = vpop.f32.mrb[9].mxu0 }
 0x2c2   :  { %v552_v3 = vpop.f32.mrb[10].mxu0  ;;  %v2561_v13 = vld [vmem:[#allocation10 + $0x68] ss:$16 sps:$4 sm:$0xff]  }
 0x2c3   :  { %v554_v14 = vpop.f32.mrb[11].mxu0  ;;  %v2504_v4 = vpop.f32.mrb[4].mxu1  ;;  %1074 = vmatpush1.bf16.msra.mxu0 %v2561_v13 }
 0x2c4   :  { %v662_v7 = vpop.f32.mrb[5].mxu1 }
 0x2c5   :  { %v3509_v8 = vadd.f32 %v662_v7, %v549_v25  ;;  %v2505_v26 = vpop.f32.mrb[6].mxu1  ;;  %v2558_v25 = vld [vmem:[#allocation10 + $0x60] ss:$16 sps:$4 sm:$0xff]   ;;  %v2569_v7 = vld [vmem:[#allocation10 + $0x8c] ss:$16 sps:$4 sm:$0xff]  }
 0x2c6   :  { %v665_v57 = vpop.f32.mrb[7].mxu1  ;;  %1001 = vmatpush1.bf16.msra.mxu1 %v2558_v25  ;;  %1075 = vmatprep.subr.bf16.mxu0 %v2569_v7 }
 0x2c7   :  { %v3511_v20 = vadd.f32 %v665_v57, %v552_v3  ;;  %749 = vadd.xlane.f32.xlu0 %v3509_v8  ;;  %v2564_v57 = vld [vmem:[#allocation10 + $0x80] ss:$16 sps:$4 sm:$0xff]  }
 0x2c8   :  { %v557_v60 = vpop.f32.mrb[12].mxu0 }
 0x2c9   :  { %v3514_v10 = vadd.f32 %v2504_v4, %v557_v60  ;;  %v559_v61 = vpop.f32.mrb[13].mxu0  ;;  %751 = vadd.xlane.f32.xlu1 %v3511_v20  ;;  %v2566_v4 = vld [vmem:[#allocation10 + $0x84] ss:$16 sps:$4 sm:$0xff]   ;;  %v2567_v60 = vld [vmem:[#allocation10 + $0x88] ss:$16 sps:$4 sm:$0xff]  }
 0x2ca   :  { %v560_v52 = vpop.f32.mrb[14].mxu0  ;;  %1002 = vmatprep.subr.bf16.mxu1 %v2566_v4  ;;  %1076 = vmatpush1.bf16.msra.mxu0 %v2567_v60  ;;  %v2572_v61 = vld [vmem:[#allocation10 + $0xa4] ss:$16 sps:$4 sm:$0xff]  }
 0x2cb   :  { %v3517_v51 = vadd.f32 %v2505_v26, %v560_v52  ;;  %v562_v62 = vpop.f32.mrb[15].mxu0  ;;  %753 = vadd.xlane.f32.xlu0 %v3514_v10  ;;  %1003 = vmatpush1.bf16.msra.mxu1 %v2564_v57  ;;  %v2575_v52 = vld [vmem:[#allocation10 + $0xac] ss:$16 sps:$4 sm:$0xff]  }
 0x2cc   :  { %v2570_v62 = vld [vmem:[#allocation10 + $0xa0] ss:$16 sps:$4 sm:$0xff]   ;;  %1004 = vmatprep.subr.bf16.mxu1 %v2572_v61  ;;  %1077 = vmatprep.subr.bf16.mxu0 %v2575_v52 }
 0x2cd   :  { %755 = vadd.xlane.f32.xlu1 %v3517_v51 }
 0x2ce   :  { %1078 = vmatpush1.bf16.msra.mxu0 %v2573_v30 }
 0x2cf   :  { %1005 = vmatpush1.bf16.msra.mxu1 %v2570_v62  ;;  %1079 = vmatprep.subr.bf16.mxu0 %v2581_v11  ;;  %v2590_v11 = vld [vmem:[#allocation11 + $0x48] sm:$0xff]  }
 0x2d0   :  { %1006 = vmatprep.subr.bf16.mxu1 %v2578_v31 }
 0x2d2   :  { %1080 = vmatpush1.bf16.msra.mxu0 %v2579_v0  ;;  %v2592_v0 = vld [vmem:[#allocation11 + $0x50] sm:$0xff]  }
 0x2d3   :  { %1007 = vmatpush1.bf16.msra.mxu1 %v2576_v33  ;;  %1081 = vmatprep.subr.bf16.mxu0 %v2587_v9  ;;  %v2591_v33 = vld [vmem:[#allocation11 + $0x8] sm:$0xff]   ;;  %v2595_v9 = vld [vmem:[#allocation11 + $0x18] sm:$0xff]  }
 0x2d4   :  { %1008 = vmatprep.subr.bf16.mxu1 %v2584_v22  ;;  %v2593_v22 = vld [vmem:[#allocation11 + $0x10] sm:$0xff]  }
 0x2d6   :  { %1082 = vmatpush1.bf16.msra.mxu0 %v2585_v6  ;;  %v2598_v6 = vld [vmem:[#allocation11 + $0x68] sm:$0xff]  }
 0x2d7   :  { %1009 = vmatpush1.bf16.msra.mxu1 %v2582_v28  ;;  %v2597_v28 = vld [vmem:[#allocation11 + $0x20] sm:$0xff]  }
 0x345   :  { %v742_v2 = vpop.xlane.xlu0 %741 }
 0x346   :  { %v758_v36 = vmul.f32 0.0078125, %v742_v2 }
 0x347   :  { %v744_v37 = vpop.xlane.xlu1 %743 }
 0x348   :  { %v3522_v15 = vsub.f32 %v3497_v46, %v758_v36  ;;  %v759_v21 = vmul.f32 0.0078125, %v744_v37 }
 0x349   :  { %v746_v35 = vpop.xlane.xlu0 %745 }
 0x34a   :  { %v3525_v38 = vsub.f32 %v3499_v32, %v759_v21  ;;  %v760_v39 = vmul.f32 0.0078125, %v746_v35  ;;  %v774_v40 = vmul.f32 %v3522_v15, %v3522_v15 }
 0x34b   :  { %v748_v16 = vpop.xlane.xlu1 %747 }
 0x34c   :  { %v3530_v18 = vsub.f32 %v3502_v49, %v760_v39  ;;  %v761_v42 = vmul.f32 0.0078125, %v748_v16  ;;  %782 = vadd.xlane.f32.xlu0 %v774_v40  ;;  %v775_v50 = vmul.f32 %v3525_v38, %v3525_v38 }
 0x34e   :  { %v3535_v54 = vsub.f32 %v3505_v59, %v761_v42  ;;  %784 = vadd.xlane.f32.xlu1 %v775_v50  ;;  %v776_v53 = vmul.f32 %v3530_v18, %v3530_v18 }
 0x350   :  { %786 = vadd.xlane.f32.xlu0 %v776_v53  ;;  %v777_v55 = vmul.f32 %v3535_v54, %v3535_v54 }
 0x352   :  { %788 = vadd.xlane.f32.xlu1 %v777_v55 }
 0x354   :  { %v750_v1 = vpop.xlane.xlu0 %749 }
 0x355   :  { %v762_v24 = vmul.f32 0.0078125, %v750_v1 }
 0x356   :  { %v752_v27 = vpop.xlane.xlu1 %751 }
 0x357   :  { %v3542_v17 = vsub.f32 %v3509_v8, %v762_v24  ;;  %v763_v5 = vmul.f32 0.0078125, %v752_v27 }
 0x358   :  { %v754_v43 = vpop.xlane.xlu0 %753 }
 0x359   :  { %v3545_v19 = vsub.f32 %v3511_v20, %v763_v5  ;;  %v764_v44 = vmul.f32 0.0078125, %v754_v43  ;;  %v778_v45 = vmul.f32 %v3542_v17, %v3542_v17 }
 0x35a   :  { %v756_v23 = vpop.xlane.xlu1 %755 }
 0x35b   :  { %v3550_v56 = vsub.f32 %v3514_v10, %v764_v44  ;;  %v765_v58 = vmul.f32 0.0078125, %v756_v23  ;;  %790 = vadd.xlane.f32.xlu0 %v778_v45  ;;  %v779_v63 = vmul.f32 %v3545_v19, %v3545_v19 }
 0x35d   :  { %v3555_v3 = vsub.f32 %v3517_v51, %v765_v58  ;;  %792 = vadd.xlane.f32.xlu1 %v779_v63  ;;  %v780_v14 = vmul.f32 %v3550_v56, %v3550_v56 }
 0x35f   :  { %794 = vadd.xlane.f32.xlu0 %v780_v14  ;;  %v781_v26 = vmul.f32 %v3555_v3, %v3555_v3 }
 0x361   :  { %796 = vadd.xlane.f32.xlu1 %v781_v26 }
 0x3d9   :  { %v783_v12 = vpop.xlane.xlu0 %782 }
 0x3da   :  { %v798_v34 = vmul.f32 0.0078125, %v783_v12  ;;  %v2599_v12 = vld [vmem:[#allocation11 + $0x28] sm:$0xff]  }
 0x3db   :  { %v785_v29 = vpop.xlane.xlu1 %784 }
 0x3dc   :  { %v806_v2 = vadd.f32 1e-05, %v798_v34  ;;  %v799_v36 = vmul.f32 0.0078125, %v785_v29  ;;  %v2600_v34 = vld [vmem:[#allocation11 + $0x70] sm:$0xff]  }
 0x3dd   :  { %v787_v37 = vpop.xlane.xlu0 %786  ;;  %v2601_v29 = vld [vmem:[#allocation11 + $0x30] sm:$0xff]  }
 0x3de   :  { %2684 = vrsqrt.f32 %v806_v2  ;;  %v807_v21 = vadd.f32 1e-05, %v799_v36  ;;  %v800_v35 = vmul.f32 0.0078125, %v787_v37  ;;  %v2602_v2 = vld [vmem:[#allocation11 + $0x78] sm:$0xff]  }
 0x3df   :  { %v789_v39 = vpop.xlane.xlu1 %788  ;;  %v2603_v36 = vld [vmem:[#allocation11 + $0x38] sm:$0xff]  }
 0x3e0   :  { %2686 = vrsqrt.f32 %v807_v21  ;;  %v801_v40 = vmul.f32 0.0078125, %v789_v39  ;;  %v808_v16 = vadd.f32 1e-05, %v800_v35 }
 0x3e2   :  { %v809_v42 = vadd.f32 1e-05, %v801_v40 }
 0x3e4   :  { %2688 = vrsqrt.f32 %v809_v42 }
 0x3e5   :  { %2690 = vrsqrt.f32 %v808_v16 }
 0x3e8   :  { %v2685_v50 = vpop.eup %2684  ;;  %v791_v53 = vpop.xlane.xlu0 %790 }
 0x3e9   :  { %v802_v55 = vmul.f32 0.0078125, %v791_v53  ;;  %v822_v27 = vmul.f32 %v2685_v50, %v3522_v15 }
 0x3ea   :  { %v2687_v1 = vpop.eup %2686  ;;  %v793_v24 = vpop.xlane.xlu1 %792 }
 0x3eb   :  { %v823_v5 = vmul.f32 %v2687_v1, %v3525_v38  ;;  %v810_v43 = vadd.f32 1e-05, %v802_v55  ;;  %v803_v44 = vmul.f32 0.0078125, %v793_v24 }
 0x3ec   :  { %v795_v45 = vpop.xlane.xlu0 %794 }
 0x3ed   :  { %2692 = vrsqrt.f32 %v810_v43  ;;  %v811_v23 = vadd.f32 1e-05, %v803_v44  ;;  %v830_v47 = vpack.c.bf16 %v823_v5, %v822_v27  ;;  %v804_v58 = vmul.f32 0.0078125, %v795_v45 }
 0x3ee   :  { %v2689_v48 = vpop.eup %2688  ;;  %v797_v63 = vpop.xlane.xlu1 %796 }
 0x3ef   :  { %2694 = vrsqrt.f32 %v811_v23  ;;  %v805_v25 = vmul.f32 0.0078125, %v797_v63  ;;  %1027 = vmatmul.mubr.bf16.vlgmr.msra.gmra.mrb[8].mxu1 %v830_v47  ;;  %1100 = vmatmul.mubr.bf16.vlgmr.msra.gmra.mrb[16].mxu0 %v830_v47  ;;  %v2691_v13 = vpop.eup %2690  ;;  %v825_v38 = vmul.f32 %v2689_v48, %v3535_v54  ;;  %v812_v14 = vadd.f32 1e-05, %v804_v58 }
 0x3f0   :  { %1036 = vmatprep.mubr.bf16.mxu1 %v3068_v41  ;;  %1109 = vmatprep.mubr.bf16.mxu0 %v3068_v41  ;;  %v824_v4 = vmul.f32 %v2691_v13, %v3530_v18 }
 0x3f1   :  { %v813_v15 = vadd.f32 1e-05, %v805_v25 }
 0x3f2   :  { %v831_v7 = vpack.c.bf16 %v825_v38, %v824_v4 }
 0x3f3   :  { %2696 = vrsqrt.f32 %v813_v15 }
 0x3f4   :  { %2698 = vrsqrt.f32 %v812_v14 }
 0x3f7   :  { %v2693_v26 = vpop.eup %2692  ;;  %1037 = vmatmul.mubr.bf16.gmra.mrb[12].mxu1 %v831_v7  ;;  %1110 = vmatmul.mubr.bf16.gmra.mrb[20].mxu0 %v831_v7 }
 0x3f8   :  { %1046 = vmatprep.mubr.bf16.mxu1 %v3068_v41  ;;  %1119 = vmatprep.mubr.bf16.mxu0 %v3068_v41  ;;  %v826_v60 = vmul.f32 %v2693_v26, %v3542_v17  ;;  %v2588_v17 = vld [vmem:[#allocation11 + $0x40] sm:$0xff]  }
 0x3f9   :  { %v2695_v57 = vpop.eup %2694  ;;  %2402 = vmatprep.subr.bf16.mxu1 %v2588_v17 }
 0x3fa   :  { %v827_v61 = vmul.f32 %v2695_v57, %v3545_v19  ;;  %v2589_v19 = vld [vmem:[#allocation11] sm:$0xff]  }
 0x3fb   :  { %2403 = vmatpush3.bf16.msra.mxu1 %v2589_v19 }
 0x3fc   :  { %v832_v52 = vpack.c.bf16 %v827_v61, %v826_v60  ;;  %2404 = vmatprep.subr.bf16.mxu1 %v2590_v11 }
 0x3fd   :  { %v2697_v54 = vpop.eup %2696 }
 0x3fe   :  { %v2699_v18 = vpop.eup %2698  ;;  %v829_v62 = vmul.f32 %v2697_v54, %v3555_v3  ;;  %v2594_v3 = vld [vmem:[#allocation11 + $0x58] sm:$0xff]  }
 0x3ff   :  { %1047 = vmatmul.mubr.bf16.gmra.mrb[16].mxu1 %v832_v52  ;;  %1120 = vmatmul.mubr.bf16.gmra.mrb[24].mxu0 %v832_v52  ;;  %v828_v30 = vmul.f32 %v2699_v18, %v3550_v56  ;;  %v2596_v56 = vld [vmem:[#allocation11 + $0x60] sm:$0xff]  }
 0x400   :  { %1056 = vmatprep.mubr.bf16.mxu1 %v3068_v41  ;;  %1129 = vmatprep.mubr.bf16.mxu0 %v3068_v41 }
 0x401   :  { %v833_v31 = vpack.c.bf16 %v829_v62, %v828_v30  ;;  %2405 = vmatpush3.bf16.msra.mxu1 %v2591_v33 }
 0x402   :  { %2406 = vmatprep.subr.bf16.mxu1 %v2592_v0 }
 0x405   :  { %2407 = vmatpush3.bf16.msra.mxu1 %v2593_v22 }
 0x406   :  { %2408 = vmatprep.subr.bf16.mxu1 %v2594_v3 }
 0x407   :  { %1057 = vmatmul.mubr.bf16.gmra.mrb[20].mxu1 %v833_v31  ;;  %1130 = vmatmul.mubr.bf16.gmra.mrb[28].mxu0 %v833_v31 }
 0x408   :  { %1793 = vmatprep.mubr.bf16.mxu0 %v3068_v41 }
 0x409   :  { %2409 = vmatpush3.bf16.msra.mxu1 %v2595_v9 }
 0x40a   :  { %2410 = vmatprep.subr.bf16.mxu1 %v2596_v56 }
 0x40d   :  { %2411 = vmatpush3.bf16.msra.mxu1 %v2597_v28 }
 0x40e   :  { %2412 = vmatprep.subr.bf16.mxu1 %v2598_v6 }
 0x411   :  { %2413 = vmatpush3.bf16.msra.mxu1 %v2599_v12 }
 0x412   :  { %2414 = vmatprep.subr.bf16.mxu1 %v2600_v34 }
 0x415   :  { %2415 = vmatpush3.bf16.msra.mxu1 %v2601_v29 }
 0x416   :  { %2416 = vmatprep.subr.bf16.mxu1 %v2602_v2 }
 0x419   :  { %2417 = vmatpush3.bf16.msra.mxu1 %v2603_v36 }
 0x4c2   :  { %v3576_v37 = vpop.f32.mrb[8].mxu1  ;;  %v3578_v21 = vpop.f32.mrb[16].mxu0 }
 0x4c3   :  { %v2294_v35 = vmul.f32 -1.442695, %v3576_v37  ;;  %v3581_v39 = vpop.f32.mrb[9].mxu1  ;;  %v3583_v40 = vpop.f32.mrb[17].mxu0 }
 0x4c4   :  { %v2295_v16 = vmul.f32 -1.442695, %v3581_v39  ;;  %v3586_v42 = vpop.f32.mrb[10].mxu1  ;;  %v3588_v50 = vpop.f32.mrb[18].mxu0 }
 0x4c5   :  { %2700 = vpow2.f32 %v2294_v35  ;;  %v2296_v53 = vmul.f32 -1.442695, %v3586_v42  ;;  %v3591_v55 = vpop.f32.mrb[11].mxu1  ;;  %v3593_v1 = vpop.f32.mrb[19].mxu0 }
 0x4c6   :  { %2702 = vpow2.f32 %v2295_v16  ;;  %v2297_v24 = vmul.f32 -1.442695, %v3591_v55 }
 0x4c7   :  { %2704 = vpow2.f32 %v2296_v53 }
 0x4c8   :  { %2706 = vpow2.f32 %v2297_v24 }
 0x4ca   :  { %v3596_v27 = vpop.f32.mrb[12].mxu1  ;;  %v3598_v5 = vpop.f32.mrb[20].mxu0 }
 0x4cb   :  { %v2298_v43 = vmul.f32 -1.442695, %v3596_v27  ;;  %v3601_v44 = vpop.f32.mrb[13].mxu1  ;;  %v3603_v45 = vpop.f32.mrb[21].mxu0 }
 0x4cc   :  { %v2299_v23 = vmul.f32 -1.442695, %v3601_v44  ;;  %v3606_v47 = vpop.f32.mrb[14].mxu1  ;;  %v3608_v48 = vpop.f32.mrb[22].mxu0 }
 0x4cd   :  { %2708 = vpow2.f32 %v2298_v43  ;;  %v2300_v58 = vmul.f32 -1.442695, %v3606_v47  ;;  %v3611_v63 = vpop.f32.mrb[15].mxu1  ;;  %v3613_v25 = vpop.f32.mrb[23].mxu0 }
 0x4ce   :  { %2710 = vpow2.f32 %v2299_v23  ;;  %v2301_v13 = vmul.f32 -1.442695, %v3611_v63 }
 0x4cf   :  { %v2701_v15 = vpop.eup %2700  ;;  %2712 = vpow2.f32 %v2300_v58 }
 0x4d0   :  { %v2703_v38 = vpop.eup %2702  ;;  %v1188_v14 = vadd.f32 1.0, %v2701_v15  ;;  %2714 = vpow2.f32 %v2301_v13 }
 0x4d1   :  { %v2705_v4 = vpop.eup %2704  ;;  %v1189_v7 = vadd.f32 1.0, %v2703_v38 }
 0x4d2   :  { %v2707_v26 = vpop.eup %2706  ;;  %2716 = vrcp.f32 %v1188_v14  ;;  %v1190_v57 = vadd.f32 1.0, %v2705_v4  ;;  %v3616_v60 = vpop.f32.mrb[16].mxu1 }
 0x4d3   :  { %v3618_v61 = vpop.f32.mrb[24].mxu0  ;;  %2718 = vrcp.f32 %v1189_v7  ;;  %v1191_v52 = vadd.f32 1.0, %v2707_v26  ;;  %v2302_v54 = vmul.f32 -1.442695, %v3616_v60  ;;  %v3621_v18 = vpop.f32.mrb[17].mxu1 }
 0x4d4   :  { %v3623_v62 = vpop.f32.mrb[25].mxu0  ;;  %2720 = vrcp.f32 %v1190_v57  ;;  %v2303_v30 = vmul.f32 -1.442695, %v3621_v18  ;;  %v3626_v31 = vpop.f32.mrb[18].mxu1 }
 0x4d5   :  { %v3628_v17 = vpop.f32.mrb[26].mxu0  ;;  %2722 = vrcp.f32 %v1191_v52  ;;  %v2304_v19 = vmul.f32 -1.442695, %v3626_v31  ;;  %v3631_v11 = vpop.f32.mrb[19].mxu1 }
 0x4d6   :  { %v3633_v33 = vpop.f32.mrb[27].mxu0  ;;  %2724 = vpow2.f32 %v2302_v54  ;;  %v2305_v0 = vmul.f32 -1.442695, %v3631_v11 }
 0x4d7   :  { %v2709_v22 = vpop.eup %2708  ;;  %2726 = vpow2.f32 %v2303_v30 }
 0x4d8   :  { %v2711_v3 = vpop.eup %2710  ;;  %v1192_v9 = vadd.f32 1.0, %v2709_v22  ;;  %2728 = vpow2.f32 %v2304_v19 }
 0x4d9   :  { %v2713_v56 = vpop.eup %2712  ;;  %v1193_v28 = vadd.f32 1.0, %v2711_v3  ;;  %2730 = vpow2.f32 %v2305_v0 }
 0x4da   :  { %v2715_v6 = vpop.eup %2714  ;;  %2732 = vrcp.f32 %v1192_v9  ;;  %v1194_v12 = vadd.f32 1.0, %v2713_v56  ;;  %v3636_v34 = vpop.f32.mrb[20].mxu1 }
 0x4db   :  { %v3638_v29 = vpop.f32.mrb[28].mxu0  ;;  %2734 = vrcp.f32 %v1193_v28  ;;  %v1195_v2 = vadd.f32 1.0, %v2715_v6  ;;  %v2306_v36 = vmul.f32 -1.442695, %v3636_v34  ;;  %v3641_v35 = vpop.f32.mrb[21].mxu1 }
 0x4dc   :  { %v3643_v16 = vpop.f32.mrb[29].mxu0  ;;  %v2717_v53 = vpop.eup %2716  ;;  %2736 = vrcp.f32 %v1194_v12  ;;  %v2307_v24 = vmul.f32 -1.442695, %v3641_v35 }
 0x4dd   :  { %v3646_v43 = vpop.f32.mrb[22].mxu1  ;;  %v3648_v23 = vpop.f32.mrb[30].mxu0  ;;  %v1236_v13 = vmul.f32 %v2717_v53, %v3576_v37  ;;  %2738 = vrcp.f32 %v1195_v2 }
 0x4de   :  { %v2719_v58 = vpop.eup %2718  ;;  %v2308_v15 = vmul.f32 -1.442695, %v3646_v43  ;;  %v3652_v38 = vpop.f32.mrb[23].mxu1  ;;  %2740 = vpow2.f32 %v2306_v36 }
 0x4df   :  { %v3654_v14 = vpop.f32.mrb[31].mxu0  ;;  %v2721_v4 = vpop.eup %2720  ;;  %v1237_v7 = vmul.f32 %v2719_v58, %v3581_v39  ;;  %v2309_v26 = vmul.f32 -1.442695, %v3652_v38  ;;  %v1252_v52 = vmul.f32 %v1236_v13, %v3578_v21  ;;  %2742 = vpow2.f32 %v2307_v24 }
 0x4e0   :  { %v2723_v57 = vpop.eup %2722  ;;  %v1238_v54 = vmul.f32 %v2721_v4, %v3586_v42  ;;  %2744 = vpow2.f32 %v2308_v15 }
 0x4e1   :  { %v2725_v37 = vpop.eup %2724  ;;  %v1253_v30 = vmul.f32 %v1237_v7, %v3583_v40  ;;  %v1239_v19 = vmul.f32 %v2723_v57, %v3591_v55  ;;  %2746 = vpow2.f32 %v2309_v26 }
 0x4e2   :  { %v2727_v0 = vpop.eup %2726  ;;  %v1254_v22 = vmul.f32 %v1238_v54, %v3588_v50  ;;  %v1196_v3 = vadd.f32 1.0, %v2725_v37 }
 0x4e3   :  { %v2729_v39 = vpop.eup %2728  ;;  %v1255_v9 = vmul.f32 %v1239_v19, %v3593_v1  ;;  %v1197_v56 = vadd.f32 1.0, %v2727_v0 }
 0x4e4   :  { %v2731_v28 = vpop.eup %2730  ;;  %v1268_v21 = vpack.c.bf16 %v1254_v22, %v1252_v52  ;;  %2748 = vrcp.f32 %v1196_v3  ;;  %v1198_v42 = vadd.f32 1.0, %v2729_v39 }
 0x4e5   :  { %v2733_v6 = vpop.eup %2732  ;;  %v1269_v12 = vpack.c.bf16 %v1255_v9, %v1253_v30  ;;  %2750 = vrcp.f32 %v1197_v56  ;;  %v1199_v40 = vadd.f32 1.0, %v2731_v28 }
 0x4e6   :  { %v2735_v2 = vpop.eup %2734  ;;  %v1240_v55 = vmul.f32 %v2733_v6, %v3596_v27  ;;  %2752 = vrcp.f32 %v1198_v42 }
 0x4e7   :  { %v2737_v36 = vpop.eup %2736  ;;  %v1241_v50 = vmul.f32 %v2735_v2, %v3601_v44  ;;  %2754 = vrcp.f32 %v1199_v40  ;;  %1404 = vmatprep.mubr.bf16.mxu1 %v1269_v12 }
 0x4e8   :  { %v2739_v53 = vpop.eup %2738  ;;  %v1256_v1 = vmul.f32 %v1240_v55, %v3598_v5  ;;  %v1242_v24 = vmul.f32 %v2737_v36, %v3606_v47  ;;  %1405 = vmatmul.mubr.bf16.vlgmr.msra.gmra.mrb[24].mxu1 %v1268_v21 }
 0x4e9   :  { %v2741_v58 = vpop.eup %2740  ;;  %v1257_v13 = vmul.f32 %v1241_v50, %v3603_v45  ;;  %v1243_v15 = vmul.f32 %v2739_v53, %v3611_v63 }
 0x4ea   :  { %v2743_v4 = vpop.eup %2742  ;;  %v1258_v27 = vmul.f32 %v1242_v24, %v3608_v48  ;;  %v1200_v7 = vadd.f32 1.0, %v2741_v58 }
 0x4eb   :  { %v2745_v26 = vpop.eup %2744  ;;  %v1259_v44 = vmul.f32 %v1243_v15, %v3613_v25  ;;  %v1201_v57 = vadd.f32 1.0, %v2743_v4 }
 0x4ec   :  { %v2747_v52 = vpop.eup %2746  ;;  %v1270_v54 = vpack.c.bf16 %v1258_v27, %v1256_v1  ;;  %2756 = vrcp.f32 %v1200_v7  ;;  %v1202_v5 = vadd.f32 1.0, %v2745_v26 }
 0x4ed   :  { %v1271_v37 = vpack.c.bf16 %v1259_v44, %v1257_v13  ;;  %2758 = vrcp.f32 %v1201_v57  ;;  %v1203_v47 = vadd.f32 1.0, %v2747_v52 }
 0x4ee   :  { %v2749_v30 = vpop.eup %2748  ;;  %2760 = vrcp.f32 %v1202_v5 }
 0x4ef   :  { %v2751_v45 = vpop.eup %2750  ;;  %v1244_v63 = vmul.f32 %v2749_v30, %v3616_v60  ;;  %2762 = vrcp.f32 %v1203_v47  ;;  %1412 = vmatprep.mubr.bf16.mxu1 %v1271_v37  ;;  %v2606_v30 = vld [vmem:[#allocation13 + $0x4] ss:$16 sps:$4 sm:$0xff]  }
 0x4f0   :  { %v2753_v48 = vpop.eup %2752  ;;  %v1245_v19 = vmul.f32 %v2751_v45, %v3621_v18  ;;  %1413 = vmatmul.mubr.bf16.gmra.mrb[28].mxu1 %v1270_v54  ;;  %v2607_v45 = vld [vmem:[#allocation13 + $0x8] ss:$16 sps:$4 sm:$0xff]   ;;  %1761 = vmatprep.subr.bf16.mxu0 %v2606_v30  ;;  %v2642_v30 = vld [vmem:[#allocation13 + $0xc4] ss:$16 sps:$4 sm:$0xff]  }
 0x4f1   :  { %v2755_v25 = vpop.eup %2754  ;;  %v1260_v0 = vmul.f32 %v1244_v63, %v3618_v61  ;;  %v1246_v22 = vmul.f32 %v2753_v48, %v3626_v31  ;;  %v2609_v63 = vld [vmem:[#allocation13 + $0xc] ss:$16 sps:$4 sm:$0xff]   ;;  %v2612_v48 = vld [vmem:[#allocation13 + $0x24] ss:$16 sps:$4 sm:$0xff]  }
 0x4f2   :  { %v1261_v3 = vmul.f32 %v1245_v19, %v3623_v62  ;;  %v1247_v39 = vmul.f32 %v2755_v25, %v3631_v11  ;;  %v2615_v19 = vld [vmem:[#allocation13 + $0x2c] ss:$16 sps:$4 sm:$0xff]   ;;  %1834 = vmatprep.subr.bf16.mxu1 %v2609_v63  ;;  %v2610_v25 = vld [vmem:[#allocation13 + $0x20] ss:$16 sps:$4 sm:$0xff]  }
 0x4f3   :  { %v1262_v9 = vmul.f32 %v1246_v22, %v3628_v17  ;;  %1835 = vmatpush1.bf16.msra.mxu1 %v2607_v45  ;;  %v2616_v22 = vld [vmem:[#allocation13 + $0x40] ss:$16 sps:$4 sm:$0xff]   ;;  %v2645_v45 = vld [vmem:[#allocation13 + $0xcc] ss:$16 sps:$4 sm:$0xff]  }
 0x4f4   :  { %v1263_v56 = vmul.f32 %v1247_v39, %v3633_v33  ;;  %1836 = vmatprep.subr.bf16.mxu1 %v2615_v19  ;;  %v2640_v63 = vld [vmem:[#allocation13 + $0xc0] ss:$16 sps:$4 sm:$0xff]   ;;  %v2648_v19 = vld [vmem:[#allocation13 + $0xe4] ss:$16 sps:$4 sm:$0xff]  }
 0x4f5   :  { %v1272_v60 = vpack.c.bf16 %v1262_v9, %v1260_v0  ;;  %v2618_v0 = vld [vmem:[#allocation13 + $0x44] ss:$16 sps:$4 sm:$0xff]  }
 0x4f6   :  { %v2757_v28 = vpop.eup %2756  ;;  %v1273_v21 = vpack.c.bf16 %v1263_v56, %v1261_v3  ;;  %v2619_v3 = vld [vmem:[#allocation13 + $0x48] ss:$16 sps:$4 sm:$0xff]  }
 0x4f7   :  { %v2759_v42 = vpop.eup %2758  ;;  %v1248_v18 = vmul.f32 %v2757_v28, %v3636_v34 }
 0x4f8   :  { %v2761_v6 = vpop.eup %2760  ;;  %v1249_v12 = vmul.f32 %v2759_v42, %v3641_v35  ;;  %1420 = vmatprep.mubr.bf16.mxu1 %v1273_v21 }
 0x4f9   :  { %v2763_v61 = vpop.eup %2762  ;;  %v1264_v31 = vmul.f32 %v1248_v18, %v3638_v29  ;;  %v1250_v62 = vmul.f32 %v2761_v6, %v3646_v43  ;;  %1421 = vmatmul.mubr.bf16.gmra.mrb[32].mxu1 %v1272_v60 }
 0x4fa   :  { %v1265_v17 = vmul.f32 %v1249_v12, %v3643_v16  ;;  %v1251_v11 = vmul.f32 %v2763_v61, %v3652_v38 }
 0x4fb   :  { %v1266_v33 = vmul.f32 %v1250_v62, %v3648_v23 }
 0x4fc   :  { %v1267_v40 = vmul.f32 %v1251_v11, %v3654_v14 }
 0x4fd   :  { %v1274_v2 = vpack.c.bf16 %v1266_v33, %v1264_v31 }
 0x4fe   :  { %v1275_v34 = vpack.c.bf16 %v1267_v40, %v1265_v17 }
 0x500   :  { %1428 = vmatprep.mubr.bf16.mxu1 %v1275_v34 }
 0x501   :  { %1429 = vmatmul.mubr.bf16.gmra.mrb[36].mxu1 %v1274_v2 }
 0x502   :  { %1866 = vmatprep.mubr.bf16.mxu1 %v3068_v41 }
 0x5bb   :  { %v2418_v35 = vpop.f32.mrb[24].mxu1 }
 0x5bc   :  { %v2419_v55 = vpop.f32.mrb[25].mxu1 }
 0x5bd   :  { %v2420_v29 = vadd.f32 %v2419_v55, %v2418_v35  ;;  %v2421_v36 = vpop.f32.mrb[26].mxu1 }
 0x5be   :  { %v2422_v43 = vpop.f32.mrb[27].mxu1 }
 0x5bf   :  { %v3690_v50 = vadd.f32 %v2420_v29, %v3497_v46  ;;  %v2423_v16 = vadd.f32 %v2422_v43, %v2421_v36  ;;  %v2624_v29 = vld [vmem:[#allocation13 + $0x64] ss:$16 sps:$4 sm:$0xff]   ;;  %v2627_v36 = vld [vmem:[#allocation13 + $0x6c] ss:$16 sps:$4 sm:$0xff]  }
 0x5c1   :  { %v3693_v38 = vadd.f32 %v2423_v16, %v3499_v32  ;;  %1509 = vadd.xlane.f32.xlu0 %v3690_v50 }
 0x5c3   :  { %v2424_v23 = vpop.f32.mrb[28].mxu1  ;;  %1511 = vadd.xlane.f32.xlu1 %v3693_v38 }
 0x5c4   :  { %v2425_v14 = vpop.f32.mrb[29].mxu1 }
 0x5c5   :  { %v2426_v53 = vadd.f32 %v2425_v14, %v2424_v23  ;;  %v2427_v1 = vpop.f32.mrb[30].mxu1  ;;  %v2622_v23 = vld [vmem:[#allocation13 + $0x60] ss:$16 sps:$4 sm:$0xff]   ;;  %v2625_v14 = vld [vmem:[#allocation13 + $0x68] ss:$16 sps:$4 sm:$0xff]  }
 0x5c6   :  { %v2428_v24 = vpop.f32.mrb[31].mxu1 }
 0x5c7   :  { %v3698_v58 = vadd.f32 %v2426_v53, %v3502_v49  ;;  %v2429_v13 = vadd.f32 %v2428_v24, %v2427_v1  ;;  %v2630_v24 = vld [vmem:[#allocation13 + $0x84] ss:$16 sps:$4 sm:$0xff]  }
 0x5c9   :  { %v3701_v46 = vadd.f32 %v2429_v13, %v3505_v59  ;;  %1513 = vadd.xlane.f32.xlu0 %v3698_v58  ;;  %v2633_v13 = vld [vmem:[#allocation13 + $0x8c] ss:$16 sps:$4 sm:$0xff]  }
 0x5cb   :  { %1515 = vadd.xlane.f32.xlu1 %v3701_v46 }
 0x5cc   :  { %v2430_v32 = vpop.f32.mrb[32].mxu1 }
 0x5cd   :  { %v2431_v15 = vpop.f32.mrb[33].mxu1 }
 0x5ce   :  { %v2432_v4 = vadd.f32 %v2431_v15, %v2430_v32  ;;  %v2433_v27 = vpop.f32.mrb[34].mxu1  ;;  %v2628_v15 = vld [vmem:[#allocation13 + $0x80] ss:$16 sps:$4 sm:$0xff]  }
 0x5cf   :  { %v2434_v7 = vpop.f32.mrb[35].mxu1 }
 0x5d0   :  { %v3706_v26 = vadd.f32 %v2432_v4, %v3509_v8  ;;  %v2435_v44 = vadd.f32 %v2434_v7, %v2433_v27  ;;  %v2631_v4 = vld [vmem:[#allocation13 + $0x88] ss:$16 sps:$4 sm:$0xff]  }
 0x5d2   :  { %v3709_v49 = vadd.f32 %v2435_v44, %v3511_v20  ;;  %1517 = vadd.xlane.f32.xlu0 %v3706_v26  ;;  %v2604_v20 = vld [vmem:[#allocation13] ss:$16 sps:$4 sm:$0xff]  }
 0x5d3   :  { %1762 = vmatpush1.bf16.msra.mxu0 %v2604_v20 }
 0x5d4   :  { %1519 = vadd.xlane.f32.xlu1 %v3709_v49  ;;  %v2436_v59 = vpop.f32.mrb[36].mxu1  ;;  %1763 = vmatprep.subr.bf16.mxu0 %v2612_v48  ;;  %v2643_v48 = vld [vmem:[#allocation13 + $0xc8] ss:$16 sps:$4 sm:$0xff]  }
 0x5d5   :  { %v2437_v57 = vpop.f32.mrb[37].mxu1 }
 0x5d6   :  { %v2438_v52 = vadd.f32 %v2437_v57, %v2436_v59  ;;  %v2439_v54 = vpop.f32.mrb[38].mxu1  ;;  %v2636_v59 = vld [vmem:[#allocation13 + $0xa4] ss:$16 sps:$4 sm:$0xff]   ;;  %v2639_v57 = vld [vmem:[#allocation13 + $0xac] ss:$16 sps:$4 sm:$0xff]  }
 0x5d7   :  { %v2440_v5 = vpop.f32.mrb[39].mxu1  ;;  %1764 = vmatpush1.bf16.msra.mxu0 %v2610_v25  ;;  %v2651_v25 = vld [vmem:[#allocation13 + $0xec] ss:$16 sps:$4 sm:$0xff]  }
 0x5d8   :  { %v3714_v37 = vadd.f32 %v2438_v52, %v3514_v10  ;;  %v2441_v47 = vadd.f32 %v2440_v5, %v2439_v54  ;;  %v2613_v10 = vld [vmem:[#allocation13 + $0x28] ss:$16 sps:$4 sm:$0xff]   ;;  %1765 = vmatprep.subr.bf16.mxu0 %v2618_v0  ;;  %v2634_v5 = vld [vmem:[#allocation13 + $0xa0] ss:$16 sps:$4 sm:$0xff]  }
 0x5d9   :  { %1837 = vmatpush1.bf16.msra.mxu1 %v2613_v10  ;;  %v2646_v10 = vld [vmem:[#allocation13 + $0xe0] ss:$16 sps:$4 sm:$0xff]   ;;  %v2649_v0 = vld [vmem:[#allocation13 + $0xe8] ss:$16 sps:$4 sm:$0xff]  }
 0x5da   :  { %v3717_v8 = vadd.f32 %v2441_v47, %v3517_v51  ;;  %1521 = vadd.xlane.f32.xlu0 %v3714_v37  ;;  %v2621_v51 = vld [vmem:[#allocation13 + $0x4c] ss:$16 sps:$4 sm:$0xff]   ;;  %v2637_v47 = vld [vmem:[#allocation13 + $0xa8] ss:$16 sps:$4 sm:$0xff]  }
 0x5db   :  { %1838 = vmatprep.subr.bf16.mxu1 %v2621_v51  ;;  %1766 = vmatpush1.bf16.msra.mxu0 %v2616_v22 }
 0x5dc   :  { %1523 = vadd.xlane.f32.xlu1 %v3717_v8  ;;  %1767 = vmatprep.subr.bf16.mxu0 %v2624_v29 }
 0x5dd   :  { %1839 = vmatpush1.bf16.msra.mxu1 %v2619_v3 }
 0x5de   :  { %1840 = vmatprep.subr.bf16.mxu1 %v2627_v36 }
 0x5df   :  { %1768 = vmatpush1.bf16.msra.mxu0 %v2622_v23 }
 0x5e0   :  { %1769 = vmatprep.subr.bf16.mxu0 %v2630_v24 }
 0x5e1   :  { %1841 = vmatpush1.bf16.msra.mxu1 %v2625_v14 }
 0x5e2   :  { %1842 = vmatprep.subr.bf16.mxu1 %v2633_v13 }
 0x5e3   :  { %1770 = vmatpush1.bf16.msra.mxu0 %v2628_v15 }
 0x5e4   :  { %1771 = vmatprep.subr.bf16.mxu0 %v2636_v59 }
 0x5e5   :  { %1843 = vmatpush1.bf16.msra.mxu1 %v2631_v4 }
 0x5e6   :  { %1844 = vmatprep.subr.bf16.mxu1 %v2639_v57 }
 0x5e7   :  { %1772 = vmatpush1.bf16.msra.mxu0 %v2634_v5 }
 0x5e8   :  { %1773 = vmatprep.subr.bf16.mxu0 %v2642_v30 }
 0x5e9   :  { %1845 = vmatpush1.bf16.msra.mxu1 %v2637_v47 }
 0x5ea   :  { %1846 = vmatprep.subr.bf16.mxu1 %v2645_v45  ;;  %v2652_v45 = vld [vmem:[#allocation14 + $0x40] sm:$0xff]  }
 0x5eb   :  { %1774 = vmatpush1.bf16.msra.mxu0 %v2640_v63  ;;  %v2655_v63 = vld [vmem:[#allocation14 + $0x8] sm:$0xff]  }
 0x5ec   :  { %1775 = vmatprep.subr.bf16.mxu0 %v2648_v19  ;;  %v2657_v19 = vld [vmem:[#allocation14 + $0x10] sm:$0xff]  }
 0x5ed   :  { %1847 = vmatpush1.bf16.msra.mxu1 %v2643_v48  ;;  %v2656_v48 = vld [vmem:[#allocation14 + $0x50] sm:$0xff]  }
 0x5ee   :  { %1848 = vmatprep.subr.bf16.mxu1 %v2651_v25  ;;  %v2659_v25 = vld [vmem:[#allocation14 + $0x18] sm:$0xff]  }
 0x5ef   :  { %1776 = vmatpush1.bf16.msra.mxu0 %v2646_v10  ;;  %v2662_v10 = vld [vmem:[#allocation14 + $0x68] sm:$0xff]  }
 0x5f0   :  { %2442 = vmatprep.subr.bf16.mxu0 %v2652_v45 }
 0x5f1   :  { %1849 = vmatpush1.bf16.msra.mxu1 %v2649_v0  ;;  %v2663_v0 = vld [vmem:[#allocation14 + $0x28] sm:$0xff]  }
 0x64e   :  { %v1510_v39 = vpop.xlane.xlu0 %1509 }
 0x64f   :  { %v1525_v9 = vmul.f32 0.0078125, %v1510_v39 }
 0x650   :  { %v1512_v56 = vpop.xlane.xlu1 %1511 }
 0x651   :  { %v3722_v60 = vsub.f32 %v3690_v50, %v1525_v9  ;;  %v1526_v28 = vmul.f32 0.0078125, %v1512_v56 }
 0x653   :  { %v3725_v21 = vsub.f32 %v3693_v38, %v1526_v28  ;;  %v1541_v42 = vmul.f32 %v3722_v60, %v3722_v60 }
 0x655   :  { %1549 = vadd.xlane.f32.xlu0 %v1541_v42  ;;  %v1542_v18 = vmul.f32 %v3725_v21, %v3725_v21 }
 0x656   :  { %v1514_v6 = vpop.xlane.xlu0 %1513 }
 0x657   :  { %v1527_v12 = vmul.f32 0.0078125, %v1514_v6  ;;  %1551 = vadd.xlane.f32.xlu1 %v1542_v18 }
 0x658   :  { %v1516_v61 = vpop.xlane.xlu1 %1515 }
 0x659   :  { %v3732_v31 = vsub.f32 %v3698_v58, %v1527_v12  ;;  %v1528_v62 = vmul.f32 0.0078125, %v1516_v61 }
 0x65b   :  { %v3735_v17 = vsub.f32 %v3701_v46, %v1528_v62  ;;  %v1543_v11 = vmul.f32 %v3732_v31, %v3732_v31 }
 0x65d   :  { %1553 = vadd.xlane.f32.xlu0 %v1543_v11  ;;  %v1544_v33 = vmul.f32 %v3735_v17, %v3735_v17 }
 0x65f   :  { %v1518_v40 = vpop.xlane.xlu0 %1517  ;;  %1555 = vadd.xlane.f32.xlu1 %v1544_v33 }
 0x660   :  { %v1529_v2 = vmul.f32 0.0078125, %v1518_v40 }
 0x661   :  { %v1520_v34 = vpop.xlane.xlu1 %1519 }
 0x662   :  { %v3742_v35 = vsub.f32 %v3706_v26, %v1529_v2  ;;  %v1530_v55 = vmul.f32 0.0078125, %v1520_v34 }
 0x664   :  { %v3745_v43 = vsub.f32 %v3709_v49, %v1530_v55  ;;  %v1545_v16 = vmul.f32 %v3742_v35, %v3742_v35 }
 0x666   :  { %1557 = vadd.xlane.f32.xlu0 %v1545_v16  ;;  %v1546_v53 = vmul.f32 %v3745_v43, %v3745_v43 }
 0x667   :  { %v1522_v1 = vpop.xlane.xlu0 %1521 }
 0x668   :  { %v1531_v32 = vmul.f32 0.0078125, %v1522_v1  ;;  %1559 = vadd.xlane.f32.xlu1 %v1546_v53 }
 0x669   :  { %v1524_v27 = vpop.xlane.xlu1 %1523 }
 0x66a   :  { %v3752_v7 = vsub.f32 %v3714_v37, %v1531_v32  ;;  %v1532_v44 = vmul.f32 0.0078125, %v1524_v27 }
 0x66c   :  { %v3755_v52 = vsub.f32 %v3717_v8, %v1532_v44  ;;  %v1547_v54 = vmul.f32 %v3752_v7, %v3752_v7 }
 0x66e   :  { %1561 = vadd.xlane.f32.xlu0 %v1547_v54  ;;  %v1548_v20 = vmul.f32 %v3755_v52, %v3755_v52 }
 0x670   :  { %1563 = vadd.xlane.f32.xlu1 %v1548_v20 }
 0x6e2   :  { %v1550_v51 = vpop.xlane.xlu0 %1549 }
 0x6e3   :  { %v1565_v22 = vmul.f32 0.0078125, %v1550_v51  ;;  %v2664_v51 = vld [vmem:[#allocation14 + $0x70] sm:$0xff]  }
 0x6e4   :  { %v1552_v3 = vpop.xlane.xlu1 %1551 }
 0x6e5   :  { %v1573_v39 = vadd.f32 1e-05, %v1565_v22  ;;  %v1566_v9 = vmul.f32 0.0078125, %v1552_v3  ;;  %v2665_v22 = vld [vmem:[#allocation14 + $0x30] sm:$0xff]   ;;  %v2666_v3 = vld [vmem:[#allocation14 + $0x78] sm:$0xff]  }
 0x6e7   :  { %2764 = vrsqrt.f32 %v1573_v39  ;;  %v1574_v56 = vadd.f32 1e-05, %v1566_v9  ;;  %v2667_v39 = vld [vmem:[#allocation14 + $0x38] sm:$0xff]  }
 0x6e9   :  { %2766 = vrsqrt.f32 %v1574_v56 }
 0x6ea   :  { %v1554_v28 = vpop.xlane.xlu0 %1553 }
 0x6eb   :  { %v1567_v42 = vmul.f32 0.0078125, %v1554_v28 }
 0x6ec   :  { %v1556_v18 = vpop.xlane.xlu1 %1555 }
 0x6ed   :  { %v1575_v6 = vadd.f32 1e-05, %v1567_v42  ;;  %v1568_v12 = vmul.f32 0.0078125, %v1556_v18 }
 0x6ef   :  { %2768 = vrsqrt.f32 %v1575_v6  ;;  %v1576_v61 = vadd.f32 1e-05, %v1568_v12 }
 0x6f1   :  { %v2765_v62 = vpop.eup %2764  ;;  %2770 = vrsqrt.f32 %v1576_v61 }
 0x6f2   :  { %v1589_v40 = vmul.f32 %v2765_v62, %v3722_v60 }
 0x6f3   :  { %v2767_v11 = vpop.eup %2766  ;;  %v1558_v33 = vpop.xlane.xlu0 %1557 }
 0x6f4   :  { %v1590_v2 = vmul.f32 %v2767_v11, %v3725_v21  ;;  %v1569_v34 = vmul.f32 0.0078125, %v1558_v33 }
 0x6f5   :  { %v1560_v55 = vpop.xlane.xlu1 %1559 }
 0x6f6   :  { %v1577_v29 = vadd.f32 1e-05, %v1569_v34  ;;  %v1570_v36 = vmul.f32 0.0078125, %v1560_v55  ;;  %v1597_v16 = vpack.c.bf16 %v1590_v2, %v1589_v40 }
 0x6f8   :  { %2772 = vrsqrt.f32 %v1577_v29  ;;  %v1578_v23 = vadd.f32 1e-05, %v1570_v36  ;;  %1794 = vmatmul.mubr.bf16.vlgmr.msra.gmra.mrb[32].mxu0 %v1597_v16  ;;  %1867 = vmatmul.mubr.bf16.vlgmr.msra.gmra.mrb[40].mxu1 %v1597_v16 }
 0x6f9   :  { %v2769_v14 = vpop.eup %2768  ;;  %1803 = vmatprep.mubr.bf16.mxu0 %v3068_v41  ;;  %1876 = vmatprep.mubr.bf16.mxu1 %v3068_v41 }
 0x6fa   :  { %2774 = vrsqrt.f32 %v1578_v23  ;;  %v1591_v21 = vmul.f32 %v2769_v14, %v3732_v31 }
 0x6fb   :  { %v2771_v53 = vpop.eup %2770  ;;  %v1562_v1 = vpop.xlane.xlu0 %1561 }
 0x6fc   :  { %v1571_v60 = vmul.f32 0.0078125, %v1562_v1  ;;  %v1592_v24 = vmul.f32 %v2771_v53, %v3735_v17 }
 0x6fd   :  { %v1564_v13 = vpop.xlane.xlu1 %1563 }
 0x6fe   :  { %v1579_v32 = vadd.f32 1e-05, %v1571_v60  ;;  %v1572_v15 = vmul.f32 0.0078125, %v1564_v13  ;;  %v1598_v4 = vpack.c.bf16 %v1592_v24, %v1591_v21 }
 0x700   :  { %2776 = vrsqrt.f32 %v1579_v32  ;;  %v1580_v27 = vadd.f32 1e-05, %v1572_v15  ;;  %1804 = vmatmul.mubr.bf16.gmra.mrb[36].mxu0 %v1598_v4  ;;  %1877 = vmatmul.mubr.bf16.gmra.mrb[44].mxu1 %v1598_v4 }
 0x701   :  { %1813 = vmatprep.mubr.bf16.mxu0 %v3068_v41  ;;  %1886 = vmatprep.mubr.bf16.mxu1 %v3068_v41 }
 0x702   :  { %v2773_v44 = vpop.eup %2772  ;;  %2778 = vrsqrt.f32 %v1580_v27 }
 0x703   :  { %v1593_v57 = vmul.f32 %v2773_v44, %v3742_v35  ;;  %v2653_v35 = vld [vmem:[#allocation14] sm:$0xff]  }
 0x704   :  { %v2775_v59 = vpop.eup %2774  ;;  %2443 = vmatpush3.bf16.msra.mxu0 %v2653_v35 }
 0x705   :  { %v1594_v31 = vmul.f32 %v2775_v59, %v3745_v43  ;;  %v2654_v43 = vld [vmem:[#allocation14 + $0x48] sm:$0xff]  }
 0x706   :  { %2444 = vmatprep.subr.bf16.mxu0 %v2654_v43 }
 0x707   :  { %v1599_v17 = vpack.c.bf16 %v1594_v31, %v1593_v57 }
 0x708   :  { %2445 = vmatpush3.bf16.msra.mxu0 %v2655_v63 }
 0x709   :  { %1814 = vmatmul.mubr.bf16.gmra.mrb[40].mxu0 %v1599_v17  ;;  %1887 = vmatmul.mubr.bf16.gmra.mrb[48].mxu1 %v1599_v17 }
 0x70a   :  { %v2777_v54 = vpop.eup %2776  ;;  %1823 = vmatprep.mubr.bf16.mxu0 %v3068_v41  ;;  %1896 = vmatprep.mubr.bf16.mxu1 %v3068_v41  ;;  %v2658_v41 = vld [vmem:[#allocation14 + $0x58] sm:$0xff]  }
 0x70b   :  { %v1595_v47 = vmul.f32 %v2777_v54, %v3752_v7  ;;  %2446 = vmatprep.subr.bf16.mxu0 %v2656_v48  ;;  %v2660_v7 = vld [vmem:[#allocation14 + $0x60] sm:$0xff]  }
 0x70c   :  { %v2779_v5 = vpop.eup %2778  ;;  %2447 = vmatpush3.bf16.msra.mxu0 %v2657_v19 }
 0x70d   :  { %v1596_v20 = vmul.f32 %v2779_v5, %v3755_v52  ;;  %2448 = vmatprep.subr.bf16.mxu0 %v2658_v41  ;;  %v2661_v52 = vld [vmem:[#allocation14 + $0x20] sm:$0xff]  }
 0x70f   :  { %v1600_v30 = vpack.c.bf16 %v1596_v20, %v1595_v47 }
 0x710   :  { %2449 = vmatpush3.bf16.msra.mxu0 %v2659_v25 }
 0x711   :  { %1824 = vmatmul.mubr.bf16.gmra.mrb[44].mxu0 %v1600_v30  ;;  %1897 = vmatmul.mubr.bf16.gmra.mrb[52].mxu1 %v1600_v30 }
 0x712   :  { %2450 = vmatprep.subr.bf16.mxu0 %v2660_v7 }
 0x714   :  { %2451 = vmatpush3.bf16.msra.mxu0 %v2661_v52 }
 0x715   :  { %2452 = vmatprep.subr.bf16.mxu0 %v2662_v10 }
 0x718   :  { %2453 = vmatpush3.bf16.msra.mxu0 %v2663_v0 }
 0x719   :  { %2454 = vmatprep.subr.bf16.mxu0 %v2664_v51 }
 0x71c   :  { %2455 = vmatpush3.bf16.msra.mxu0 %v2665_v22 }
 0x71d   :  { %2456 = vmatprep.subr.bf16.mxu0 %v2666_v3 }
 0x720   :  { %2457 = vmatpush3.bf16.msra.mxu0 %v2667_v39 }
 0x7cb   :  { %v3775_v9 = vpop.f32.mrb[32].mxu0  ;;  %v3777_v56 = vpop.f32.mrb[40].mxu1 }
 0x7cc   :  { %v2358_v28 = vmul.f32 -1.442695, %v3775_v9  ;;  %v3780_v42 = vpop.f32.mrb[33].mxu0  ;;  %v3782_v18 = vpop.f32.mrb[41].mxu1 }
 0x7cd   :  { %v2359_v6 = vmul.f32 -1.442695, %v3780_v42  ;;  %v3785_v12 = vpop.f32.mrb[34].mxu0  ;;  %v3787_v61 = vpop.f32.mrb[42].mxu1 }
 0x7ce   :  { %2780 = vpow2.f32 %v2358_v28  ;;  %v2360_v62 = vmul.f32 -1.442695, %v3785_v12  ;;  %v3790_v11 = vpop.f32.mrb[35].mxu0  ;;  %v3792_v33 = vpop.f32.mrb[43].mxu1 }
 0x7cf   :  { %2782 = vpow2.f32 %v2359_v6  ;;  %v2361_v40 = vmul.f32 -1.442695, %v3790_v11 }
 0x7d0   :  { %2784 = vpow2.f32 %v2360_v62 }
 0x7d1   :  { %2786 = vpow2.f32 %v2361_v40 }
 0x7d3   :  { %v3795_v2 = vpop.f32.mrb[36].mxu0  ;;  %v3797_v34 = vpop.f32.mrb[44].mxu1 }
 0x7d4   :  { %v2362_v55 = vmul.f32 -1.442695, %v3795_v2  ;;  %v3800_v29 = vpop.f32.mrb[37].mxu0  ;;  %v3802_v36 = vpop.f32.mrb[45].mxu1 }
 0x7d5   :  { %v2363_v16 = vmul.f32 -1.442695, %v3800_v29  ;;  %v3805_v23 = vpop.f32.mrb[38].mxu0  ;;  %v3807_v14 = vpop.f32.mrb[46].mxu1 }
 0x7d6   :  { %2788 = vpow2.f32 %v2362_v55  ;;  %v2364_v53 = vmul.f32 -1.442695, %v3805_v23  ;;  %v3810_v1 = vpop.f32.mrb[39].mxu0  ;;  %v3812_v60 = vpop.f32.mrb[47].mxu1 }
 0x7d7   :  { %2790 = vpow2.f32 %v2363_v16  ;;  %v2365_v21 = vmul.f32 -1.442695, %v3810_v1 }
 0x7d8   :  { %v2781_v24 = vpop.eup %2780  ;;  %2792 = vpow2.f32 %v2364_v53 }
 0x7d9   :  { %v2783_v13 = vpop.eup %2782  ;;  %v1955_v32 = vadd.f32 1.0, %v2781_v24  ;;  %2794 = vpow2.f32 %v2365_v21 }
 0x7da   :  { %v2785_v15 = vpop.eup %2784  ;;  %v1956_v4 = vadd.f32 1.0, %v2783_v13 }
 0x7db   :  { %v2787_v27 = vpop.eup %2786  ;;  %2796 = vrcp.f32 %v1955_v32  ;;  %v1957_v44 = vadd.f32 1.0, %v2785_v15 }
 0x7dc   :  { %2798 = vrcp.f32 %v1956_v4  ;;  %v1958_v59 = vadd.f32 1.0, %v2787_v27  ;;  %v3815_v57 = vpop.f32.mrb[40].mxu0  ;;  %v3817_v31 = vpop.f32.mrb[48].mxu1 }
 0x7dd   :  { %2800 = vrcp.f32 %v1957_v44  ;;  %v2366_v17 = vmul.f32 -1.442695, %v3815_v57  ;;  %v3820_v54 = vpop.f32.mrb[41].mxu0  ;;  %v3822_v5 = vpop.f32.mrb[49].mxu1 }
 0x7de   :  { %2802 = vrcp.f32 %v1958_v59  ;;  %v2367_v47 = vmul.f32 -1.442695, %v3820_v54  ;;  %v3825_v20 = vpop.f32.mrb[42].mxu0  ;;  %v3827_v30 = vpop.f32.mrb[50].mxu1 }
 0x7df   :  { %2804 = vpow2.f32 %v2366_v17  ;;  %v2368_v45 = vmul.f32 -1.442695, %v3825_v20  ;;  %v3830_v35 = vpop.f32.mrb[43].mxu0  ;;  %v3832_v43 = vpop.f32.mrb[51].mxu1 }
 0x7e0   :  { %v2789_v63 = vpop.eup %2788  ;;  %2806 = vpow2.f32 %v2367_v47  ;;  %v2369_v48 = vmul.f32 -1.442695, %v3830_v35 }
 0x7e1   :  { %v2791_v19 = vpop.eup %2790  ;;  %v1959_v41 = vadd.f32 1.0, %v2789_v63  ;;  %2808 = vpow2.f32 %v2368_v45 }
 0x7e2   :  { %v2793_v25 = vpop.eup %2792  ;;  %v1960_v7 = vadd.f32 1.0, %v2791_v19  ;;  %2810 = vpow2.f32 %v2369_v48 }
 0x7e3   :  { %v2795_v52 = vpop.eup %2794  ;;  %2812 = vrcp.f32 %v1959_v41  ;;  %v1961_v10 = vadd.f32 1.0, %v2793_v25 }
 0x7e4   :  { %2814 = vrcp.f32 %v1960_v7  ;;  %v1962_v0 = vadd.f32 1.0, %v2795_v52  ;;  %v3835_v51 = vpop.f32.mrb[44].mxu0  ;;  %v3837_v22 = vpop.f32.mrb[52].mxu1 }
 0x7e5   :  { %v2797_v3 = vpop.eup %2796  ;;  %2816 = vrcp.f32 %v1961_v10  ;;  %v2370_v39 = vmul.f32 -1.442695, %v3835_v51  ;;  %v3840_v28 = vpop.f32.mrb[45].mxu0 }
 0x7e6   :  { %v3842_v6 = vpop.f32.mrb[53].mxu1  ;;  %v2799_v62 = vpop.eup %2798  ;;  %v2003_v40 = vmul.f32 %v2797_v3, %v3775_v9  ;;  %2818 = vrcp.f32 %v1962_v0  ;;  %v2371_v55 = vmul.f32 -1.442695, %v3840_v28 }
 0x7e7   :  { %v3846_v16 = vpop.f32.mrb[46].mxu0  ;;  %v3848_v53 = vpop.f32.mrb[54].mxu1  ;;  %v2004_v24 = vmul.f32 %v2799_v62, %v3780_v42  ;;  %2820 = vpow2.f32 %v2370_v39 }
 0x7e8   :  { %v2801_v21 = vpop.eup %2800  ;;  %v2372_v13 = vmul.f32 -1.442695, %v3846_v16  ;;  %v3852_v32 = vpop.f32.mrb[47].mxu0  ;;  %v2019_v9 = vmul.f32 %v2003_v40, %v3777_v56  ;;  %2822 = vpow2.f32 %v2371_v55 }
 0x7e9   :  { %v3854_v15 = vpop.f32.mrb[55].mxu1  ;;  %v2803_v4 = vpop.eup %2802  ;;  %v2005_v27 = vmul.f32 %v2801_v21, %v3785_v12  ;;  %v2373_v44 = vmul.f32 -1.442695, %v3852_v32  ;;  %v2020_v17 = vmul.f32 %v2004_v24, %v3782_v18 }
 0x7ea   :  { %v2805_v59 = vpop.eup %2804  ;;  %v2006_v42 = vmul.f32 %v2803_v4, %v3790_v11  ;;  %2824 = vpow2.f32 %v2372_v13 }
 0x7eb   :  { %v2807_v47 = vpop.eup %2806  ;;  %v2021_v45 = vmul.f32 %v2005_v27, %v3787_v61  ;;  %v1963_v63 = vadd.f32 1.0, %v2805_v59  ;;  %2826 = vpow2.f32 %v2373_v44 }
 0x7ec   :  { %v2809_v48 = vpop.eup %2808  ;;  %v2022_v19 = vmul.f32 %v2006_v42, %v3792_v33  ;;  %v1964_v56 = vadd.f32 1.0, %v2807_v47 }
 0x7ed   :  { %v2811_v41 = vpop.eup %2810  ;;  %v2035_v12 = vpack.c.bf16 %v2021_v45, %v2019_v9  ;;  %2828 = vrcp.f32 %v1963_v63  ;;  %v1965_v25 = vadd.f32 1.0, %v2809_v48 }
 0x7ee   :  { %v2813_v7 = vpop.eup %2812  ;;  %v2036_v52 = vpack.c.bf16 %v2022_v19, %v2020_v17  ;;  %2830 = vrcp.f32 %v1964_v56  ;;  %v1966_v18 = vadd.f32 1.0, %v2811_v41 }
 0x7ef   :  { %v2815_v10 = vpop.eup %2814  ;;  %v2007_v11 = vmul.f32 %v2813_v7, %v3795_v2  ;;  %2832 = vrcp.f32 %v1965_v25 }
 0x7f0   :  { %v2817_v0 = vpop.eup %2816  ;;  %v2008_v61 = vmul.f32 %v2815_v10, %v3800_v29  ;;  %2834 = vrcp.f32 %v1966_v18  ;;  %2171 = vmatprep.mubr.bf16.mxu0 %v2036_v52 }
 0x7f1   :  { %v2819_v3 = vpop.eup %2818  ;;  %v2023_v33 = vmul.f32 %v2007_v11, %v3797_v34  ;;  %v2009_v39 = vmul.f32 %v2817_v0, %v3805_v23  ;;  %2172 = vmatmul.mubr.bf16.vlgmr.msra.gmra.mrb[48].mxu0 %v2035_v12 }
 0x7f2   :  { %v2821_v62 = vpop.eup %2820  ;;  %v2024_v40 = vmul.f32 %v2008_v61, %v3802_v36  ;;  %v2010_v55 = vmul.f32 %v2819_v3, %v3810_v1 }
 0x7f3   :  { %v2823_v21 = vpop.eup %2822  ;;  %v2025_v2 = vmul.f32 %v2009_v39, %v3807_v14  ;;  %v1967_v24 = vadd.f32 1.0, %v2821_v62 }
 0x7f4   :  { %v2825_v13 = vpop.eup %2824  ;;  %v2026_v29 = vmul.f32 %v2010_v55, %v3812_v60  ;;  %v1968_v4 = vadd.f32 1.0, %v2823_v21 }
 0x7f5   :  { %v2827_v9 = vpop.eup %2826  ;;  %v2037_v27 = vpack.c.bf16 %v2025_v2, %v2023_v33  ;;  %2836 = vrcp.f32 %v1967_v24  ;;  %v1969_v34 = vadd.f32 1.0, %v2825_v13 }
 0x7f6   :  { %v2038_v44 = vpack.c.bf16 %v2026_v29, %v2024_v40  ;;  %2838 = vrcp.f32 %v1968_v4  ;;  %v1970_v23 = vadd.f32 1.0, %v2827_v9 }
 0x7f7   :  { %v2829_v59 = vpop.eup %2828  ;;  %2840 = vrcp.f32 %v1969_v34 }
 0x7f8   :  { %v2831_v36 = vpop.eup %2830  ;;  %v2011_v1 = vmul.f32 %v2829_v59, %v3815_v57  ;;  %2842 = vrcp.f32 %v1970_v23  ;;  %2179 = vmatprep.mubr.bf16.mxu0 %v2038_v44 }
 0x7f9   :  { %v2833_v14 = vpop.eup %2832  ;;  %v2012_v17 = vmul.f32 %v2831_v36, %v3820_v54  ;;  %2180 = vmatmul.mubr.bf16.gmra.mrb[52].mxu0 %v2037_v27 }
 0x7fa   :  { %v2835_v60 = vpop.eup %2834  ;;  %v2027_v42 = vmul.f32 %v2011_v1, %v3817_v31  ;;  %v2013_v47 = vmul.f32 %v2833_v14, %v3825_v20 }
 0x7fb   :  { %v2028_v45 = vmul.f32 %v2012_v17, %v3822_v5  ;;  %v2014_v63 = vmul.f32 %v2835_v60, %v3830_v35 }
 0x7fc   :  { %v2029_v48 = vmul.f32 %v2013_v47, %v3827_v30 }
 0x7fd   :  { %v2030_v19 = vmul.f32 %v2014_v63, %v3832_v43 }
 0x7fe   :  { %v2039_v57 = vpack.c.bf16 %v2029_v48, %v2027_v42 }
 0x7ff   :  { %v2837_v56 = vpop.eup %2836  ;;  %v2040_v41 = vpack.c.bf16 %v2030_v19, %v2028_v45 }
 0x800   :  { %v2839_v12 = vpop.eup %2838  ;;  %v2015_v54 = vmul.f32 %v2837_v56, %v3835_v51 }
 0x801   :  { %v2841_v25 = vpop.eup %2840  ;;  %v2016_v7 = vmul.f32 %v2839_v12, %v3840_v28  ;;  %2187 = vmatprep.mubr.bf16.mxu0 %v2040_v41 }
 0x802   :  { %v2843_v31 = vpop.eup %2842  ;;  %v2031_v20 = vmul.f32 %v2015_v54, %v3837_v22  ;;  %v2017_v5 = vmul.f32 %v2841_v25, %v3846_v16  ;;  %2188 = vmatmul.mubr.bf16.gmra.mrb[56].mxu0 %v2039_v57 }
 0x803   :  { %v2032_v30 = vmul.f32 %v2016_v7, %v3842_v6  ;;  %v2018_v35 = vmul.f32 %v2843_v31, %v3852_v32 }
 0x804   :  { %v2033_v43 = vmul.f32 %v2017_v5, %v3848_v53 }
 0x805   :  { %v2034_v52 = vmul.f32 %v2018_v35, %v3854_v15 }
 0x806   :  { %v2041_v18 = vpack.c.bf16 %v2033_v43, %v2031_v20 }
 0x807   :  { %v2042_v51 = vpack.c.bf16 %v2034_v52, %v2032_v30 }
 0x809   :  { %2195 = vmatprep.mubr.bf16.mxu0 %v2042_v51 }
 0x80a   :  { %2196 = vmatmul.mubr.bf16.gmra.mrb[60].mxu0 %v2041_v18 }
 0x8c4   :  { %v2458_v28 = vpop.f32.mrb[48].mxu0 }
 0x8c5   :  { %v2459_v10 = vpop.f32.mrb[49].mxu0 }
 0x8c6   :  { %v2460_v11 = vadd.f32 %v2459_v10, %v2458_v28  ;;  %v2461_v0 = vpop.f32.mrb[50].mxu0 }
 0x8c7   :  { %v2462_v22 = vpop.f32.mrb[51].mxu0 }
 0x8c8   :  { %v2204_v16 = vadd.f32 %v2460_v11, %v3690_v50  ;;  %v2463_v61 = vadd.f32 %v2462_v22, %v2461_v0 }
 0x8ca   :  { %2212 = vst [vmem:[#allocation16] sm:$0xff] %v2204_v16  ;;  %v2205_v6 = vadd.f32 %v2463_v61, %v3693_v38 }
 0x8cc   :  { %2213 = vst [vmem:[#allocation16 + $0x8] sm:$0xff] %v2205_v6  ;;  %v2464_v32 = vpop.f32.mrb[52].mxu0 }
 0x8cd   :  { %v2465_v53 = vpop.f32.mrb[53].mxu0 }
 0x8ce   :  { %v2466_v3 = vadd.f32 %v2465_v53, %v2464_v32  ;;  %v2467_v15 = vpop.f32.mrb[54].mxu0 }
 0x8cf   :  { %v2468_v33 = vpop.f32.mrb[55].mxu0 }
 0x8d0   :  { %v2206_v39 = vadd.f32 %v2466_v3, %v3698_v58  ;;  %v2469_v62 = vadd.f32 %v2468_v33, %v2467_v15 }
 0x8d2   :  { %2214 = vst [vmem:[#allocation16 + $0x10] sm:$0xff] %v2206_v39  ;;  %v2207_v40 = vadd.f32 %v2469_v62, %v3701_v46 }
 0x8d4   :  { %2215 = vst [vmem:[#allocation16 + $0x18] sm:$0xff] %v2207_v40 }
 0x8d5   :  { %v2470_v55 = vpop.f32.mrb[56].mxu0 }
 0x8d6   :  { %v2471_v21 = vpop.f32.mrb[57].mxu0 }
 0x8d7   :  { %v2472_v50 = vadd.f32 %v2471_v21, %v2470_v55  ;;  %v2473_v2 = vpop.f32.mrb[58].mxu0 }
 0x8d8   :  { %v2474_v24 = vpop.f32.mrb[59].mxu0 }
 0x8d9   :  { %v2208_v38 = vadd.f32 %v2472_v50, %v3706_v26  ;;  %v2475_v13 = vadd.f32 %v2474_v24, %v2473_v2 }
 0x8db   :  { %2216 = vst [vmem:[#allocation16 + $0x20] sm:$0xff] %v2208_v38  ;;  %v2209_v29 = vadd.f32 %v2475_v13, %v3709_v49 }
 0x8dd   :  { %2217 = vst [vmem:[#allocation16 + $0x28] sm:$0xff] %v2209_v29  ;;  %v2476_v4 = vpop.f32.mrb[60].mxu0 }
 0x8de   :  { %v2477_v9 = vpop.f32.mrb[61].mxu0 }
 0x8df   :  { %v2478_v58 = vadd.f32 %v2477_v9, %v2476_v4  ;;  %v2479_v27 = vpop.f32.mrb[62].mxu0 }
 0x8e0   :  { %v2480_v34 = vpop.f32.mrb[63].mxu0 }
 0x8e1   :  { %v2210_v46 = vadd.f32 %v2478_v58, %v3714_v37  ;;  %v2481_v44 = vadd.f32 %v2480_v34, %v2479_v27 }
 0x8e3   :  { %2218 = vst [vmem:[#allocation16 + $0x30] sm:$0xff] %v2210_v46  ;;  %v2211_v23 = vadd.f32 %v2481_v44, %v3717_v8 }
 0x8e5   :  { %2219 = vst [vmem:[#allocation16 + $0x38] sm:$0xff] %v2211_v23 }
 0x8e6   :  { %3031 = shalt.err (!%p3028_p12)
}
 0x8e7   :  { %s3032_s3 = scalar_lea.hbm %s3918_s8, 1024 }
 0x8e8   :  { %p3033_p13 = scmp.ne.s32.totalorder %s3918_s8, %s3032_s3  ;;  %p3036_p0 = scmp.lt.u32.totalorder %s3032_s3, %s3918_s8 }
 0x8ea   :  { %p3038_p1 = pnand %p3036_p0, %p3033_p13 }
 0x8ec   :  { %3041 = shalt.err (!%p3038_p1)
}
 0x8ed   :  { %2231 = dma.vmem_to_hbm [thread:$0]  %s2226_s16, 1024, %s3918_s8, [#allocation4], %s3062_s5, %s3062_s5, %s3063_s22  }
 0x8ee   :  { %3052 = dma.done.wait [#allocation4], 1024  }
 0x8ef   :  { %3053 = vsyncadd [#allocation4], 4294966272 }
 0x8f0   :  { %2235 = vsyncpa [#allocation3], 1 }
 0x8f1   :  { %2236 = vsyncpa [#allocation6], 1 }
 0x8f2   :  { %2237 = vsyncpa [#allocation9], 1 }
 0x8f3   :  { %2238 = vsyncpa [#allocation12], 1 }
 0x8f4   :  { %2239 = vsyncpa [#allocation15], 1 }
 0x8f5   :  { %2240 = vsyncpa [#allocation4], 1 }

</bundles_post_ra>
